<compile_context>
chip_gen: v7x
topology: tpu7x:2x2x1
jax: 0.10.0
libtpu: 0.0.40
codegen_flags: <defaults>
</compile_context>

<pallas_src>
import math

import jax
import jax.numpy as jnp
import numpy as np
from jax.experimental import pallas as pl
from jax.experimental.pallas import tpu as pltpu  # noqa: F401  (TPU tuning hooks)

# ----- model hyper-parameters (small, consistent with the module) -----------
B, S = 2, 8
D_MODEL = 32
NHEAD = 4
HEAD_DIM = D_MODEL // NHEAD
D_FF = 64
NUM_EXPERTS = 4
TOP_K = 2
CAPACITY_FACTOR = 1.0
EPS = 1e-5
T = B * S  # number of tokens

_SQRT_HALF = 0.7071067811865476


# ============================ in-kernel helpers =============================
def _erf_approx(x):
    """Abramowitz & Stegun 7.1.26 erf approximation, |err| < 1.5e-7."""
    p = 0.3275911
    a1, a2, a3, a4, a5 = (0.254829592, -0.284496736, 1.421413741,
                          -1.453152027, 1.061405429)
    ax = jnp.abs(x)
    t = 1.0 / (1.0 + p * ax)
    poly = ((((a5 * t + a4) * t + a3) * t + a2) * t + a1) * t
    y = 1.0 - poly * jnp.exp(-(ax * ax))
    return jnp.where(x >= 0.0, y, -y)


def _gelu_exact(x):
    """Exact (erf-based) GELU, matching torch.nn.GELU() default."""
    return 0.5 * x * (1.0 + _erf_approx(x * _SQRT_HALF))


# ============================ fused Pallas kernel ===========================
def fused_moe_transformer_kernel(x_ref, vec_ref, wqkvo_ref, wrt_ref,
                                 w1p_ref, b1p_ref, w2p_ref, b2s_ref,
                                 o_ref, aux_ref):
    """norm1 + MHA + residual + norm2 + router + top-2 routing + capacity +
    aux loss + all experts + combine + residual — one invocation, no grid."""
    xf = x_ref[...].reshape(T, D_MODEL)                     # (16, 32)

    vecs = vec_ref[...]                                      # (8, 32)
    g1, bn1 = vecs[0:1, :], vecs[1:2, :]
    g2, bn2 = vecs[2:3, :], vecs[3:4, :]
    bq, bk = vecs[4:5, :], vecs[5:6, :]
    bv, bo = vecs[6:7, :], vecs[7:8, :]

    # --- LayerNorm (norm1) ---------------------------------------------------
    mu = jnp.mean(xf, axis=-1, keepdims=True)
    var = jnp.mean((xf - mu) ** 2, axis=-1, keepdims=True)
    xn = (xf - mu) * jax.lax.rsqrt(var + EPS) * g1 + bn1

    # --- multi-head self-attention (pre-split weights, q/k/v at lane 0) -----
    scale = 1.0 / math.sqrt(HEAD_DIM)
    q = (jnp.dot(xn, wqkvo_ref[0], preferred_element_type=jnp.float32) + bq) * scale
    k = jnp.dot(xn, wqkvo_ref[1], preferred_element_type=jnp.float32) + bk
    v = jnp.dot(xn, wqkvo_ref[2], preferred_element_type=jnp.float32) + bv
    wo_t = wqkvo_ref[3]                                      # (32, 32), loaded once

    q3 = q.reshape(B, S, D_MODEL)
    k3 = k.reshape(B, S, D_MODEL)
    v3 = v.reshape(B, S, D_MODEL)

    attn = jnp.zeros((T, D_MODEL), jnp.float32)
    for h in range(NHEAD):                                   # 4 tiny iterations
        lo = h * HEAD_DIM
        sc = jnp.einsum('bqd,bkd->bqk',
                        q3[:, :, lo:lo + HEAD_DIM], k3[:, :, lo:lo + HEAD_DIM],
                        preferred_element_type=jnp.float32)           # (B, S, S)
        sc = sc - jnp.max(sc, axis=-1, keepdims=True)
        p = jnp.exp(sc)
        p = p / jnp.sum(p, axis=-1, keepdims=True)
        hv = jnp.einsum('bqk,bkd->bqd', p, v3[:, :, lo:lo + HEAD_DIM],
                        preferred_element_type=jnp.float32)           # (B, S, HD)
        # per-head output projection accumulated (Wo^T rows are 8-aligned)
        attn = attn + jnp.dot(hv.reshape(T, HEAD_DIM),
                              wo_t[lo:lo + HEAD_DIM, :],
                              preferred_element_type=jnp.float32)
    x1 = attn + bo + xf                                       # residual 1

    # --- LayerNorm (norm2) + router logits -----------------------------------
    mu2 = jnp.mean(x1, axis=-1, keepdims=True)
    var2 = jnp.mean((x1 - mu2) ** 2, axis=-1, keepdims=True)
    xn2 = (x1 - mu2) * jax.lax.rsqrt(var2 + EPS) * g2 + bn2
    logits = jnp.dot(xn2, wrt_ref[...],
                     preferred_element_type=jnp.float32)      # (16, 4)

    # --- in-kernel top-2 routing (lowest-index tie-break, like lax.top_k) ----
    lmax = jnp.max(logits, axis=-1, keepdims=True)
    el = jnp.exp(logits - lmax)
    probs = el / jnp.sum(el, axis=-1, keepdims=True)          # softmax

    eidx = jax.lax.broadcasted_iota(jnp.int32, (T, NUM_EXPERTS), 1).astype(jnp.float32)
    big = float(NUM_EXPERTS)
    m1 = jnp.max(probs, axis=-1, keepdims=True)
    i1 = big - jnp.max(jnp.where(probs == m1, big - eidx, 0.0),
                       axis=-1, keepdims=True)                 # lowest argmax
    one1 = eidx == i1
    masked = jnp.where(one1, -1.0, probs)                     # probs >= 0 > -1
    m2 = jnp.max(masked, axis=-1, keepdims=True)
    i2 = big - jnp.max(jnp.where(masked == m2, big - eidx, 0.0),
                       axis=-1, keepdims=True)
    one2 = eidx == i2

    denom = m1 + m2                                            # renormalize top-2
    w_pe = jnp.where(one1, m1 / denom, 0.0) + jnp.where(one2, m2 / denom, 0.0)
    mask_b = one1 | one2
    mask_f = mask_b.astype(jnp.float32)                        # (16, 4)

    # --- load-balancing aux loss ---------------------------------------------
    counts = jnp.sum(mask_f, axis=0, keepdims=True)            # (1, 4)
    ideal = float(T * TOP_K) / float(NUM_EXPERTS)
    aux_ref[...] = jnp.sum((counts - ideal) ** 2, axis=-1,
                           keepdims=True) / float(T * T)       # (1, 1)

    # --- capacity: keep first `capacity` routed tokens per expert ------------
    rr = jax.lax.broadcasted_iota(jnp.int32, (T, T), 0)
    cc = jax.lax.broadcasted_iota(jnp.int32, (T, T), 1)
    tril = (cc <= rr).astype(jnp.float32)                      # inclusive prefix-sum
    cum = jnp.dot(tril, mask_f, preferred_element_type=jnp.float32)   # (16, 4)
    capacity = float(int(CAPACITY_FACTOR * T / NUM_EXPERTS))
    keep = mask_b & (cum <= capacity)
    combine = jnp.where(keep, w_pe, 0.0)                       # (16, 4)

    # --- all experts fused, lane-dense ---------------------------------------
    h1 = jnp.dot(xn2, w1p_ref[...],
                 preferred_element_type=jnp.float32) + b1p_ref[...]    # (16, 256)
    h1 = _gelu_exact(h1)
    # expand combine (16,4) -> (16,256) per 64-lane expert block on the MXU
    er = jax.lax.broadcasted_iota(jnp.int32, (NUM_EXPERTS, NUM_EXPERTS * D_FF), 0)
    ec = jax.lax.broadcasted_iota(jnp.int32, (NUM_EXPERTS, NUM_EXPERTS * D_FF), 1)
    expand = ((ec >= er * D_FF) & (ec < (er + 1) * D_FF)).astype(jnp.float32)
    h1 = h1 * jnp.dot(combine, expand, preferred_element_type=jnp.float32)
    y = jnp.dot(h1, w2p_ref[...], preferred_element_type=jnp.float32)   # (16, 32)
    yb = jnp.dot(combine, b2s_ref[...], preferred_element_type=jnp.float32)

    o_ref[...] = (y + yb + x1).reshape(B, S, D_MODEL)          # residual 2


# ============================ forward wrapper ===============================
@jax.jit
def moe_transformer_forward(x, packed):
    vecs, w_qkvo, wr_t, w1p, b1p, w2p, b2s = packed
    out, aux = pl.pallas_call(
        fused_moe_transformer_kernel,
        out_shape=(jax.ShapeDtypeStruct((B, S, D_MODEL), jnp.float32),
                   jax.ShapeDtypeStruct((1, 1), jnp.float32)),
    )(x, vecs, w_qkvo, wr_t, w1p, b1p, w2p, b2s)
    return out, aux[0, 0]


# ====================== one-time parameter packing ==========================
def pack_params(params):
    """Pack PyTorch-layout params into lane/sublane-friendly slabs.  Runs ONCE
    outside the jitted hot path (perf review item #2/#6/#10)."""
    (g1, bn1, g2, bn2, wqkv, bqkv, wo, bo, wr, w1s, b1s, w2s, b2s) = params
    wq_t = wqkv[0:D_MODEL, :].T
    wk_t = wqkv[D_MODEL:2 * D_MODEL, :].T
    wv_t = wqkv[2 * D_MODEL:, :].T
    w_qkvo = jnp.stack([wq_t, wk_t, wv_t, wo.T], axis=0)            # (4, 32, 32)
    vecs = jnp.stack([g1[0], bn1[0], g2[0], bn2[0],
                      bqkv[0, 0:D_MODEL], bqkv[0, D_MODEL:2 * D_MODEL],
                      bqkv[0, 2 * D_MODEL:], bo[0]], axis=0)         # (8, 32)
    wr_t = wr.T                                                      # (32, 4)
    w1p = w1s.transpose(1, 0, 2).reshape(D_MODEL, NUM_EXPERTS * D_FF)  # (32, 256)
    b1p = b1s.reshape(1, NUM_EXPERTS * D_FF)                         # (1, 256)
    w2p = w2s.reshape(NUM_EXPERTS * D_FF, D_MODEL)                   # (256, 32)
    b2stack = b2s.reshape(NUM_EXPERTS, D_MODEL)                      # (4, 32)
    return (vecs, w_qkvo, wr_t, w1p, b1p, w2p, b2stack)


# ============================ pure-JAX reference ============================
def routing_glue(logits):
    """softmax -> top-k -> renorm -> capacity mask -> combine weights, aux."""
    probs = jax.nn.softmax(logits, axis=-1)
    topw, topi = jax.lax.top_k(probs, TOP_K)                   # (T, K)
    topw = topw / jnp.sum(topw, axis=-1, keepdims=True)

    onehot = topi[..., None] == jnp.arange(NUM_EXPERTS)        # (T, K, E)
    counts = jnp.sum(onehot.astype(jnp.float32), axis=(0, 1))  # (E,)
    ideal = T * TOP_K / NUM_EXPERTS
    aux_loss = jnp.sum((counts - ideal) ** 2) / (T ** 2)

    capacity = int(CAPACITY_FACTOR * T / NUM_EXPERTS)
    w_per_expert = jnp.sum(jnp.where(onehot, topw[..., None], 0.0), axis=1)
    mask = jnp.any(onehot, axis=1)                             # (T, E)
    rank = jnp.cumsum(mask.astype(jnp.int32), axis=0) - 1      # token-order rank
    keep = mask & (rank < capacity)
    combine = jnp.where(keep, w_per_expert, 0.0)
    return combine, aux_loss


def reference_forward(x, params):
    (g1, bn1, g2, bn2, wqkv, bqkv, wo, bo, wr, w1s, b1s, w2s, b2s) = params

    def layernorm(v, g, b):
        mu = v.mean(-1, keepdims=True)
        var = ((v - mu) ** 2).mean(-1, keepdims=True)
        return (v - mu) / jnp.sqrt(var + EPS) * g + b

    res = x
    xn = layernorm(x, g1.reshape(-1), bn1.reshape(-1))
    qkv = xn @ wqkv.T + bqkv.reshape(-1)
    q, k, v = jnp.split(qkv, 3, axis=-1)

    def split_heads(t):
        return t.reshape(B, S, NHEAD, HEAD_DIM).transpose(0, 2, 1, 3)

    q = split_heads(q) / math.sqrt(HEAD_DIM)
    k = split_heads(k)
    v = split_heads(v)
    sc = q @ k.transpose(0, 1, 3, 2)
    p = jax.nn.softmax(sc, axis=-1)
    a = (p @ v).transpose(0, 2, 1, 3).reshape(B, S, D_MODEL)
    a = a @ wo.T + bo.reshape(-1)
    x1 = a + res

    xn2 = layernorm(x1, g2.reshape(-1), bn2.reshape(-1))
    xf = xn2.reshape(T, D_MODEL)
    logits = xf @ wr.T
    combine, aux = routing_glue(logits)

    out = jnp.zeros((T, D_MODEL), jnp.float32)
    for e in range(NUM_EXPERTS):
        h = jax.nn.gelu(xf @ w1s[e] + b1s[e, 0], approximate=False)
        y = h @ w2s[e] + b2s[e, 0]
        out = out + combine[:, e:e + 1] * y
    return out.reshape(B, S, D_MODEL) + x1, aux


# ================================ main ======================================
def make_params(key):
    ks = jax.random.split(key, 16)
    nrm = lambda k, shape, s=0.05: (s * jax.random.normal(k, shape)).astype(jnp.float32)
    g1 = 1.0 + nrm(ks[0], (1, D_MODEL), 0.1)
    bn1 = nrm(ks[1], (1, D_MODEL), 0.1)
    g2 = 1.0 + nrm(ks[2], (1, D_MODEL), 0.1)
    bn2 = nrm(ks[3], (1, D_MODEL), 0.1)
    wqkv = nrm(ks[4], (3 * D_MODEL, D_MODEL))
    bqkv = nrm(ks[5], (1, 3 * D_MODEL))
    wo = nrm(ks[6], (D_MODEL, D_MODEL))
    bo = nrm(ks[7], (1, D_MODEL))
    wr = nrm(ks[8], (NUM_EXPERTS, D_MODEL), 0.2)
    w1s = nrm(ks[9], (NUM_EXPERTS, D_MODEL, D_FF))
    b1s = nrm(ks[10], (NUM_EXPERTS, 1, D_FF))
    w2s = nrm(ks[11], (NUM_EXPERTS, D_FF, D_MODEL))
    b2s = nrm(ks[12], (NUM_EXPERTS, 1, D_MODEL))
    return (g1, bn1, g2, bn2, wqkv, bqkv, wo, bo, wr, w1s, b1s, w2s, b2s)


if __name__ == "__main__":
    key = jax.random.PRNGKey(0)
    kx, kp = jax.random.split(key)
    x = jax.random.normal(kx, (B, S, D_MODEL), jnp.float32)
    params = make_params(kp)
    packed = pack_params(params)          # one-time packing, off the hot path

    out, aux = moe_transformer_forward(x, packed)
    out = jax.block_until_ready(out)
    aux = jax.block_until_ready(aux)

    ref_out, ref_aux = reference_forward(x, params)
    np.testing.assert_allclose(np.asarray(out), np.asarray(ref_out),
                               rtol=2e-3, atol=2e-3)
    np.testing.assert_allclose(float(aux), float(ref_aux), rtol=1e-5, atol=1e-6)

    print("KERNEL_OK")
</pallas_src>

<mosaic_0001>
module attributes {stable_mosaic.version = 11 : i64} {
  func.func @fused_moe_transformer_kernel(%arg0: memref<2x8x32xf32, #tpu.memory_space<vmem>>, %arg1: memref<8x32xf32, #tpu.memory_space<vmem>>, %arg2: memref<4x32x32xf32, #tpu.memory_space<vmem>>, %arg3: memref<32x4xf32, #tpu.memory_space<vmem>>, %arg4: memref<32x256xf32, #tpu.memory_space<vmem>>, %arg5: memref<1x256xf32, #tpu.memory_space<vmem>>, %arg6: memref<256x32xf32, #tpu.memory_space<vmem>>, %arg7: memref<4x32xf32, #tpu.memory_space<vmem>>, %arg8: memref<2x8x32xf32, #tpu.memory_space<vmem>>, %arg9: memref<1x1xf32, #tpu.memory_space<vmem>>) attributes {dimension_semantics = [], scalar_prefetch = 0 : i64, scratch_operands = 0 : i64, tpu.core_type = #tpu.core_type<tc>} {
    %c0 = arith.constant 0 : index
    %c0_0 = arith.constant 0 : index
    %c0_1 = arith.constant 0 : index
    %0 = vector.load %arg0[%c0, %c0_0, %c0_1] : memref<2x8x32xf32, #tpu.memory_space<vmem>>, vector<2x8x32xf32>
    %1 = vector.shape_cast %0 : vector<2x8x32xf32> to vector<16x32xf32>
    %c0_2 = arith.constant 0 : index
    %c0_3 = arith.constant 0 : index
    %2 = vector.load %arg1[%c0_2, %c0_3] : memref<8x32xf32, #tpu.memory_space<vmem>>, vector<8x32xf32>
    %3 = vector.extract_strided_slice %2 {offsets = [0, 0], sizes = [1, 32], strides = [1, 1]} : vector<8x32xf32> to vector<1x32xf32>
    %4 = vector.extract_strided_slice %2 {offsets = [1, 0], sizes = [1, 32], strides = [1, 1]} : vector<8x32xf32> to vector<1x32xf32>
    %5 = vector.extract_strided_slice %2 {offsets = [2, 0], sizes = [1, 32], strides = [1, 1]} : vector<8x32xf32> to vector<1x32xf32>
    %6 = vector.extract_strided_slice %2 {offsets = [3, 0], sizes = [1, 32], strides = [1, 1]} : vector<8x32xf32> to vector<1x32xf32>
    %7 = vector.extract_strided_slice %2 {offsets = [4, 0], sizes = [1, 32], strides = [1, 1]} : vector<8x32xf32> to vector<1x32xf32>
    %8 = vector.extract_strided_slice %2 {offsets = [5, 0], sizes = [1, 32], strides = [1, 1]} : vector<8x32xf32> to vector<1x32xf32>
    %9 = vector.extract_strided_slice %2 {offsets = [6, 0], sizes = [1, 32], strides = [1, 1]} : vector<8x32xf32> to vector<1x32xf32>
    %10 = vector.extract_strided_slice %2 {offsets = [7, 0], sizes = [1, 32], strides = [1, 1]} : vector<8x32xf32> to vector<1x32xf32>
    %cst = arith.constant dense<0.000000e+00> : vector<16xf32>
    %11 = vector.multi_reduction <add>, %1, %cst [1] : vector<16x32xf32> to vector<16xf32>
    %12 = vector.shape_cast %11 : vector<16xf32> to vector<16x1xf32>
    %cst_4 = arith.constant 3.200000e+01 : f32
    %13 = vector.broadcast %cst_4 : f32 to vector<16x1xf32>
    %14 = arith.divf %12, %13 : vector<16x1xf32>
    %15 = vector.broadcast %14 : vector<16x1xf32> to vector<16x32xf32>
    %16 = arith.subf %1, %15 : vector<16x32xf32>
    %17 = arith.mulf %16, %16 : vector<16x32xf32>
    %cst_5 = arith.constant dense<0.000000e+00> : vector<16xf32>
    %18 = vector.multi_reduction <add>, %17, %cst_5 [1] : vector<16x32xf32> to vector<16xf32>
    %19 = vector.shape_cast %18 : vector<16xf32> to vector<16x1xf32>
    %cst_6 = arith.constant 3.200000e+01 : f32
    %20 = vector.broadcast %cst_6 : f32 to vector<16x1xf32>
    %21 = arith.divf %19, %20 : vector<16x1xf32>
    %22 = vector.broadcast %14 : vector<16x1xf32> to vector<16x32xf32>
    %23 = arith.subf %1, %22 : vector<16x32xf32>
    %cst_7 = arith.constant 9.99999974E-6 : f32
    %24 = vector.broadcast %cst_7 : f32 to vector<16x1xf32>
    %25 = arith.addf %21, %24 : vector<16x1xf32>
    %26 = math.rsqrt %25 : vector<16x1xf32>
    %27 = vector.broadcast %26 : vector<16x1xf32> to vector<16x32xf32>
    %28 = arith.mulf %23, %27 : vector<16x32xf32>
    %29 = vector.broadcast %3 : vector<1x32xf32> to vector<16x32xf32>
    %30 = arith.mulf %28, %29 : vector<16x32xf32>
    %31 = vector.broadcast %4 : vector<1x32xf32> to vector<16x32xf32>
    %32 = arith.addf %30, %31 : vector<16x32xf32>
    %c0_8 = arith.constant 0 : index
    %c0_9 = arith.constant 0 : index
    %c0_10 = arith.constant 0 : index
    %33 = vector.load %arg2[%c0_8, %c0_9, %c0_10] : memref<4x32x32xf32, #tpu.memory_space<vmem>>, vector<1x32x32xf32>
    %34 = vector.shape_cast %33 : vector<1x32x32xf32> to vector<32x32xf32>
    %cst_11 = arith.constant dense<0.000000e+00> : vector<16x32xf32>
    %35 = tpu.matmul %32, %34, %cst_11 {dimension_numbers = #tpu.dot_dimension_numbers<[1], [0], [0], [1], [0, 0, 1, 1], [], []>} : vector<16x32xf32>, vector<32x32xf32>, vector<16x32xf32> -> vector<16x32xf32>
    %36 = vector.broadcast %7 : vector<1x32xf32> to vector<16x32xf32>
    %37 = arith.addf %35, %36 : vector<16x32xf32>
    %cst_12 = arith.constant 0.353553385 : f32
    %38 = vector.broadcast %cst_12 : f32 to vector<16x32xf32>
    %39 = arith.mulf %37, %38 : vector<16x32xf32>
    %c1 = arith.constant 1 : index
    %c0_13 = arith.constant 0 : index
    %c0_14 = arith.constant 0 : index
    %40 = vector.load %arg2[%c1, %c0_13, %c0_14] : memref<4x32x32xf32, #tpu.memory_space<vmem>>, vector<1x32x32xf32>
    %41 = vector.shape_cast %40 : vector<1x32x32xf32> to vector<32x32xf32>
    %cst_15 = arith.constant dense<0.000000e+00> : vector<16x32xf32>
    %42 = tpu.matmul %32, %41, %cst_15 {dimension_numbers = #tpu.dot_dimension_numbers<[1], [0], [0], [1], [0, 0, 1, 1], [], []>} : vector<16x32xf32>, vector<32x32xf32>, vector<16x32xf32> -> vector<16x32xf32>
    %43 = vector.broadcast %8 : vector<1x32xf32> to vector<16x32xf32>
    %44 = arith.addf %42, %43 : vector<16x32xf32>
    %c2 = arith.constant 2 : index
    %c0_16 = arith.constant 0 : index
    %c0_17 = arith.constant 0 : index
    %45 = vector.load %arg2[%c2, %c0_16, %c0_17] : memref<4x32x32xf32, #tpu.memory_space<vmem>>, vector<1x32x32xf32>
    %46 = vector.shape_cast %45 : vector<1x32x32xf32> to vector<32x32xf32>
    %cst_18 = arith.constant dense<0.000000e+00> : vector<16x32xf32>
    %47 = tpu.matmul %32, %46, %cst_18 {dimension_numbers = #tpu.dot_dimension_numbers<[1], [0], [0], [1], [0, 0, 1, 1], [], []>} : vector<16x32xf32>, vector<32x32xf32>, vector<16x32xf32> -> vector<16x32xf32>
    %48 = vector.broadcast %9 : vector<1x32xf32> to vector<16x32xf32>
    %49 = arith.addf %47, %48 : vector<16x32xf32>
    %c3 = arith.constant 3 : index
    %c0_19 = arith.constant 0 : index
    %c0_20 = arith.constant 0 : index
    %50 = vector.load %arg2[%c3, %c0_19, %c0_20] : memref<4x32x32xf32, #tpu.memory_space<vmem>>, vector<1x32x32xf32>
    %51 = vector.shape_cast %50 : vector<1x32x32xf32> to vector<32x32xf32>
    %52 = vector.shape_cast %39 : vector<16x32xf32> to vector<2x8x32xf32>
    %53 = vector.shape_cast %44 : vector<16x32xf32> to vector<2x8x32xf32>
    %54 = vector.shape_cast %49 : vector<16x32xf32> to vector<2x8x32xf32>
    %cst_21 = arith.constant 0.000000e+00 : f32
    %55 = vector.broadcast %cst_21 : f32 to vector<16x32xf32>
    %56 = vector.extract_strided_slice %52 {offsets = [0, 0, 0], sizes = [2, 8, 8], strides = [1, 1, 1]} : vector<2x8x32xf32> to vector<2x8x8xf32>
    %57 = vector.extract_strided_slice %53 {offsets = [0, 0, 0], sizes = [2, 8, 8], strides = [1, 1, 1]} : vector<2x8x32xf32> to vector<2x8x8xf32>
    "tpu.trace_start"() <{level = 10 : i32, message = "bqd,bkd->bqk"}> : () -> ()
    %cst_22 = arith.constant dense<0.000000e+00> : vector<2x8x8xf32>
    %58 = tpu.matmul %56, %57, %cst_22 {dimension_numbers = #tpu.dot_dimension_numbers<[2], [2], [1], [1], [0, 0, 0, 1, 1, 1], [0], [0]>} : vector<2x8x8xf32>, vector<2x8x8xf32>, vector<2x8x8xf32> -> vector<2x8x8xf32>
    "tpu.trace_stop"() : () -> ()
    %cst_23 = arith.constant dense<0xFF800000> : vector<2x8xf32>
    %59 = vector.multi_reduction <maximumf>, %58, %cst_23 [2] : vector<2x8x8xf32> to vector<2x8xf32>
    %60 = vector.shape_cast %59 : vector<2x8xf32> to vector<2x8x1xf32>
    %61 = vector.broadcast %60 : vector<2x8x1xf32> to vector<2x8x8xf32>
    %62 = arith.subf %58, %61 : vector<2x8x8xf32>
    %63 = math.exp %62 : vector<2x8x8xf32>
    %cst_24 = arith.constant dense<0.000000e+00> : vector<2x8xf32>
    %64 = vector.multi_reduction <add>, %63, %cst_24 [2] : vector<2x8x8xf32> to vector<2x8xf32>
    %65 = vector.shape_cast %64 : vector<2x8xf32> to vector<2x8x1xf32>
    %66 = vector.broadcast %65 : vector<2x8x1xf32> to vector<2x8x8xf32>
    %67 = arith.divf %63, %66 : vector<2x8x8xf32>
    %68 = vector.extract_strided_slice %54 {offsets = [0, 0, 0], sizes = [2, 8, 8], strides = [1, 1, 1]} : vector<2x8x32xf32> to vector<2x8x8xf32>
    "tpu.trace_start"() <{level = 10 : i32, message = "bqk,bkd->bqd"}> : () -> ()
    %cst_25 = arith.constant dense<0.000000e+00> : vector<2x8x8xf32>
    %69 = tpu.matmul %67, %68, %cst_25 {dimension_numbers = #tpu.dot_dimension_numbers<[2], [1], [1], [2], [0, 0, 0, 1, 1, 2], [0], [0]>} : vector<2x8x8xf32>, vector<2x8x8xf32>, vector<2x8x8xf32> -> vector<2x8x8xf32>
    "tpu.trace_stop"() : () -> ()
    %70 = vector.shape_cast %69 : vector<2x8x8xf32> to vector<16x8xf32>
    %71 = vector.extract_strided_slice %51 {offsets = [0, 0], sizes = [8, 32], strides = [1, 1]} : vector<32x32xf32> to vector<8x32xf32>
    %cst_26 = arith.constant dense<0.000000e+00> : vector<16x32xf32>
    %72 = tpu.matmul %70, %71, %cst_26 {dimension_numbers = #tpu.dot_dimension_numbers<[1], [0], [0], [1], [0, 0, 1, 1], [], []>} : vector<16x8xf32>, vector<8x32xf32>, vector<16x32xf32> -> vector<16x32xf32>
    %73 = arith.addf %55, %72 : vector<16x32xf32>
    %74 = vector.extract_strided_slice %52 {offsets = [0, 0, 8], sizes = [2, 8, 8], strides = [1, 1, 1]} : vector<2x8x32xf32> to vector<2x8x8xf32>
    %75 = vector.extract_strided_slice %53 {offsets = [0, 0, 8], sizes = [2, 8, 8], strides = [1, 1, 1]} : vector<2x8x32xf32> to vector<2x8x8xf32>
    "tpu.trace_start"() <{level = 10 : i32, message = "bqd,bkd->bqk"}> : () -> ()
    %cst_27 = arith.constant dense<0.000000e+00> : vector<2x8x8xf32>
    %76 = tpu.matmul %74, %75, %cst_27 {dimension_numbers = #tpu.dot_dimension_numbers<[2], [2], [1], [1], [0, 0, 0, 1, 1, 1], [0], [0]>} : vector<2x8x8xf32>, vector<2x8x8xf32>, vector<2x8x8xf32> -> vector<2x8x8xf32>
    "tpu.trace_stop"() : () -> ()
    %cst_28 = arith.constant dense<0xFF800000> : vector<2x8xf32>
    %77 = vector.multi_reduction <maximumf>, %76, %cst_28 [2] : vector<2x8x8xf32> to vector<2x8xf32>
    %78 = vector.shape_cast %77 : vector<2x8xf32> to vector<2x8x1xf32>
    %79 = vector.broadcast %78 : vector<2x8x1xf32> to vector<2x8x8xf32>
    %80 = arith.subf %76, %79 : vector<2x8x8xf32>
    %81 = math.exp %80 : vector<2x8x8xf32>
    %cst_29 = arith.constant dense<0.000000e+00> : vector<2x8xf32>
    %82 = vector.multi_reduction <add>, %81, %cst_29 [2] : vector<2x8x8xf32> to vector<2x8xf32>
    %83 = vector.shape_cast %82 : vector<2x8xf32> to vector<2x8x1xf32>
    %84 = vector.broadcast %83 : vector<2x8x1xf32> to vector<2x8x8xf32>
    %85 = arith.divf %81, %84 : vector<2x8x8xf32>
    %86 = vector.extract_strided_slice %54 {offsets = [0, 0, 8], sizes = [2, 8, 8], strides = [1, 1, 1]} : vector<2x8x32xf32> to vector<2x8x8xf32>
    "tpu.trace_start"() <{level = 10 : i32, message = "bqk,bkd->bqd"}> : () -> ()
    %cst_30 = arith.constant dense<0.000000e+00> : vector<2x8x8xf32>
    %87 = tpu.matmul %85, %86, %cst_30 {dimension_numbers = #tpu.dot_dimension_numbers<[2], [1], [1], [2], [0, 0, 0, 1, 1, 2], [0], [0]>} : vector<2x8x8xf32>, vector<2x8x8xf32>, vector<2x8x8xf32> -> vector<2x8x8xf32>
    "tpu.trace_stop"() : () -> ()
    %88 = vector.shape_cast %87 : vector<2x8x8xf32> to vector<16x8xf32>
    %89 = vector.extract_strided_slice %51 {offsets = [8, 0], sizes = [8, 32], strides = [1, 1]} : vector<32x32xf32> to vector<8x32xf32>
    %cst_31 = arith.constant dense<0.000000e+00> : vector<16x32xf32>
    %90 = tpu.matmul %88, %89, %cst_31 {dimension_numbers = #tpu.dot_dimension_numbers<[1], [0], [0], [1], [0, 0, 1, 1], [], []>} : vector<16x8xf32>, vector<8x32xf32>, vector<16x32xf32> -> vector<16x32xf32>
    %91 = arith.addf %73, %90 : vector<16x32xf32>
    %92 = vector.extract_strided_slice %52 {offsets = [0, 0, 16], sizes = [2, 8, 8], strides = [1, 1, 1]} : vector<2x8x32xf32> to vector<2x8x8xf32>
    %93 = vector.extract_strided_slice %53 {offsets = [0, 0, 16], sizes = [2, 8, 8], strides = [1, 1, 1]} : vector<2x8x32xf32> to vector<2x8x8xf32>
    "tpu.trace_start"() <{level = 10 : i32, message = "bqd,bkd->bqk"}> : () -> ()
    %cst_32 = arith.constant dense<0.000000e+00> : vector<2x8x8xf32>
    %94 = tpu.matmul %92, %93, %cst_32 {dimension_numbers = #tpu.dot_dimension_numbers<[2], [2], [1], [1], [0, 0, 0, 1, 1, 1], [0], [0]>} : vector<2x8x8xf32>, vector<2x8x8xf32>, vector<2x8x8xf32> -> vector<2x8x8xf32>
    "tpu.trace_stop"() : () -> ()
    %cst_33 = arith.constant dense<0xFF800000> : vector<2x8xf32>
    %95 = vector.multi_reduction <maximumf>, %94, %cst_33 [2] : vector<2x8x8xf32> to vector<2x8xf32>
    %96 = vector.shape_cast %95 : vector<2x8xf32> to vector<2x8x1xf32>
    %97 = vector.broadcast %96 : vector<2x8x1xf32> to vector<2x8x8xf32>
    %98 = arith.subf %94, %97 : vector<2x8x8xf32>
    %99 = math.exp %98 : vector<2x8x8xf32>
    %cst_34 = arith.constant dense<0.000000e+00> : vector<2x8xf32>
    %100 = vector.multi_reduction <add>, %99, %cst_34 [2] : vector<2x8x8xf32> to vector<2x8xf32>
    %101 = vector.shape_cast %100 : vector<2x8xf32> to vector<2x8x1xf32>
    %102 = vector.broadcast %101 : vector<2x8x1xf32> to vector<2x8x8xf32>
    %103 = arith.divf %99, %102 : vector<2x8x8xf32>
    %104 = vector.extract_strided_slice %54 {offsets = [0, 0, 16], sizes = [2, 8, 8], strides = [1, 1, 1]} : vector<2x8x32xf32> to vector<2x8x8xf32>
    "tpu.trace_start"() <{level = 10 : i32, message = "bqk,bkd->bqd"}> : () -> ()
    %cst_35 = arith.constant dense<0.000000e+00> : vector<2x8x8xf32>
    %105 = tpu.matmul %103, %104, %cst_35 {dimension_numbers = #tpu.dot_dimension_numbers<[2], [1], [1], [2], [0, 0, 0, 1, 1, 2], [0], [0]>} : vector<2x8x8xf32>, vector<2x8x8xf32>, vector<2x8x8xf32> -> vector<2x8x8xf32>
    "tpu.trace_stop"() : () -> ()
    %106 = vector.shape_cast %105 : vector<2x8x8xf32> to vector<16x8xf32>
    %107 = vector.extract_strided_slice %51 {offsets = [16, 0], sizes = [8, 32], strides = [1, 1]} : vector<32x32xf32> to vector<8x32xf32>
    %cst_36 = arith.constant dense<0.000000e+00> : vector<16x32xf32>
    %108 = tpu.matmul %106, %107, %cst_36 {dimension_numbers = #tpu.dot_dimension_numbers<[1], [0], [0], [1], [0, 0, 1, 1], [], []>} : vector<16x8xf32>, vector<8x32xf32>, vector<16x32xf32> -> vector<16x32xf32>
    %109 = arith.addf %91, %108 : vector<16x32xf32>
    %110 = vector.extract_strided_slice %52 {offsets = [0, 0, 24], sizes = [2, 8, 8], strides = [1, 1, 1]} : vector<2x8x32xf32> to vector<2x8x8xf32>
    %111 = vector.extract_strided_slice %53 {offsets = [0, 0, 24], sizes = [2, 8, 8], strides = [1, 1, 1]} : vector<2x8x32xf32> to vector<2x8x8xf32>
    "tpu.trace_start"() <{level = 10 : i32, message = "bqd,bkd->bqk"}> : () -> ()
    %cst_37 = arith.constant dense<0.000000e+00> : vector<2x8x8xf32>
    %112 = tpu.matmul %110, %111, %cst_37 {dimension_numbers = #tpu.dot_dimension_numbers<[2], [2], [1], [1], [0, 0, 0, 1, 1, 1], [0], [0]>} : vector<2x8x8xf32>, vector<2x8x8xf32>, vector<2x8x8xf32> -> vector<2x8x8xf32>
    "tpu.trace_stop"() : () -> ()
    %cst_38 = arith.constant dense<0xFF800000> : vector<2x8xf32>
    %113 = vector.multi_reduction <maximumf>, %112, %cst_38 [2] : vector<2x8x8xf32> to vector<2x8xf32>
    %114 = vector.shape_cast %113 : vector<2x8xf32> to vector<2x8x1xf32>
    %115 = vector.broadcast %114 : vector<2x8x1xf32> to vector<2x8x8xf32>
    %116 = arith.subf %112, %115 : vector<2x8x8xf32>
    %117 = math.exp %116 : vector<2x8x8xf32>
    %cst_39 = arith.constant dense<0.000000e+00> : vector<2x8xf32>
    %118 = vector.multi_reduction <add>, %117, %cst_39 [2] : vector<2x8x8xf32> to vector<2x8xf32>
    %119 = vector.shape_cast %118 : vector<2x8xf32> to vector<2x8x1xf32>
    %120 = vector.broadcast %119 : vector<2x8x1xf32> to vector<2x8x8xf32>
    %121 = arith.divf %117, %120 : vector<2x8x8xf32>
    %122 = vector.extract_strided_slice %54 {offsets = [0, 0, 24], sizes = [2, 8, 8], strides = [1, 1, 1]} : vector<2x8x32xf32> to vector<2x8x8xf32>
    "tpu.trace_start"() <{level = 10 : i32, message = "bqk,bkd->bqd"}> : () -> ()
    %cst_40 = arith.constant dense<0.000000e+00> : vector<2x8x8xf32>
    %123 = tpu.matmul %121, %122, %cst_40 {dimension_numbers = #tpu.dot_dimension_numbers<[2], [1], [1], [2], [0, 0, 0, 1, 1, 2], [0], [0]>} : vector<2x8x8xf32>, vector<2x8x8xf32>, vector<2x8x8xf32> -> vector<2x8x8xf32>
    "tpu.trace_stop"() : () -> ()
    %124 = vector.shape_cast %123 : vector<2x8x8xf32> to vector<16x8xf32>
    %125 = vector.extract_strided_slice %51 {offsets = [24, 0], sizes = [8, 32], strides = [1, 1]} : vector<32x32xf32> to vector<8x32xf32>
    %cst_41 = arith.constant dense<0.000000e+00> : vector<16x32xf32>
    %126 = tpu.matmul %124, %125, %cst_41 {dimension_numbers = #tpu.dot_dimension_numbers<[1], [0], [0], [1], [0, 0, 1, 1], [], []>} : vector<16x8xf32>, vector<8x32xf32>, vector<16x32xf32> -> vector<16x32xf32>
    %127 = arith.addf %109, %126 : vector<16x32xf32>
    %128 = vector.broadcast %10 : vector<1x32xf32> to vector<16x32xf32>
    %129 = arith.addf %127, %128 : vector<16x32xf32>
    %130 = arith.addf %129, %1 : vector<16x32xf32>
    %cst_42 = arith.constant dense<0.000000e+00> : vector<16xf32>
    %131 = vector.multi_reduction <add>, %130, %cst_42 [1] : vector<16x32xf32> to vector<16xf32>
    %132 = vector.shape_cast %131 : vector<16xf32> to vector<16x1xf32>
    %cst_43 = arith.constant 3.200000e+01 : f32
    %133 = vector.broadcast %cst_43 : f32 to vector<16x1xf32>
    %134 = arith.divf %132, %133 : vector<16x1xf32>
    %135 = vector.broadcast %134 : vector<16x1xf32> to vector<16x32xf32>
    %136 = arith.subf %130, %135 : vector<16x32xf32>
    %137 = arith.mulf %136, %136 : vector<16x32xf32>
    %cst_44 = arith.constant dense<0.000000e+00> : vector<16xf32>
    %138 = vector.multi_reduction <add>, %137, %cst_44 [1] : vector<16x32xf32> to vector<16xf32>
    %139 = vector.shape_cast %138 : vector<16xf32> to vector<16x1xf32>
    %cst_45 = arith.constant 3.200000e+01 : f32
    %140 = vector.broadcast %cst_45 : f32 to vector<16x1xf32>
    %141 = arith.divf %139, %140 : vector<16x1xf32>
    %142 = vector.broadcast %134 : vector<16x1xf32> to vector<16x32xf32>
    %143 = arith.subf %130, %142 : vector<16x32xf32>
    %cst_46 = arith.constant 9.99999974E-6 : f32
    %144 = vector.broadcast %cst_46 : f32 to vector<16x1xf32>
    %145 = arith.addf %141, %144 : vector<16x1xf32>
    %146 = math.rsqrt %145 : vector<16x1xf32>
    %147 = vector.broadcast %146 : vector<16x1xf32> to vector<16x32xf32>
    %148 = arith.mulf %143, %147 : vector<16x32xf32>
    %149 = vector.broadcast %5 : vector<1x32xf32> to vector<16x32xf32>
    %150 = arith.mulf %148, %149 : vector<16x32xf32>
    %151 = vector.broadcast %6 : vector<1x32xf32> to vector<16x32xf32>
    %152 = arith.addf %150, %151 : vector<16x32xf32>
    %c0_47 = arith.constant 0 : index
    %c0_48 = arith.constant 0 : index
    %153 = vector.load %arg3[%c0_47, %c0_48] : memref<32x4xf32, #tpu.memory_space<vmem>>, vector<32x4xf32>
    %cst_49 = arith.constant dense<0.000000e+00> : vector<16x4xf32>
    %154 = tpu.matmul %152, %153, %cst_49 {dimension_numbers = #tpu.dot_dimension_numbers<[1], [0], [0], [1], [0, 0, 1, 1], [], []>} : vector<16x32xf32>, vector<32x4xf32>, vector<16x4xf32> -> vector<16x4xf32>
    %cst_50 = arith.constant dense<0xFF800000> : vector<16xf32>
    %155 = vector.multi_reduction <maximumf>, %154, %cst_50 [1] : vector<16x4xf32> to vector<16xf32>
    %156 = vector.shape_cast %155 : vector<16xf32> to vector<16x1xf32>
    %157 = vector.broadcast %156 : vector<16x1xf32> to vector<16x4xf32>
    %158 = arith.subf %154, %157 : vector<16x4xf32>
    %159 = math.exp %158 : vector<16x4xf32>
    %cst_51 = arith.constant dense<0.000000e+00> : vector<16xf32>
    %160 = vector.multi_reduction <add>, %159, %cst_51 [1] : vector<16x4xf32> to vector<16xf32>
    %161 = vector.shape_cast %160 : vector<16xf32> to vector<16x1xf32>
    %162 = vector.broadcast %161 : vector<16x1xf32> to vector<16x4xf32>
    %163 = arith.divf %159, %162 : vector<16x4xf32>
    %164 = tpu.iota {dimensions = array<i32: 1>} : vector<16x4xi32>
    %165 = arith.sitofp %164 : vector<16x4xi32> to vector<16x4xf32>
    %cst_52 = arith.constant dense<0xFF800000> : vector<16xf32>
    %166 = vector.multi_reduction <maximumf>, %163, %cst_52 [1] : vector<16x4xf32> to vector<16xf32>
    %167 = vector.shape_cast %166 : vector<16xf32> to vector<16x1xf32>
    %168 = vector.broadcast %167 : vector<16x1xf32> to vector<16x4xf32>
    %169 = arith.cmpf oeq, %163, %168 : vector<16x4xf32>
    %cst_53 = arith.constant 4.000000e+00 : f32
    %170 = vector.broadcast %cst_53 : f32 to vector<16x4xf32>
    %171 = arith.subf %170, %165 : vector<16x4xf32>
    %cst_54 = arith.constant 0.000000e+00 : f32
    %172 = vector.broadcast %cst_54 : f32 to vector<16x4xf32>
    %173 = arith.select %169, %171, %172 : vector<16x4xi1>, vector<16x4xf32>
    %cst_55 = arith.constant dense<0xFF800000> : vector<16xf32>
    %174 = vector.multi_reduction <maximumf>, %173, %cst_55 [1] : vector<16x4xf32> to vector<16xf32>
    %175 = vector.shape_cast %174 : vector<16xf32> to vector<16x1xf32>
    %cst_56 = arith.constant 4.000000e+00 : f32
    %176 = vector.broadcast %cst_56 : f32 to vector<16x1xf32>
    %177 = arith.subf %176, %175 : vector<16x1xf32>
    %178 = vector.broadcast %177 : vector<16x1xf32> to vector<16x4xf32>
    %179 = arith.cmpf oeq, %165, %178 : vector<16x4xf32>
    %cst_57 = arith.constant -1.000000e+00 : f32
    %180 = vector.broadcast %cst_57 : f32 to vector<16x4xf32>
    %181 = arith.select %179, %180, %163 : vector<16x4xi1>, vector<16x4xf32>
    %cst_58 = arith.constant dense<0xFF800000> : vector<16xf32>
    %182 = vector.multi_reduction <maximumf>, %181, %cst_58 [1] : vector<16x4xf32> to vector<16xf32>
    %183 = vector.shape_cast %182 : vector<16xf32> to vector<16x1xf32>
    %184 = vector.broadcast %183 : vector<16x1xf32> to vector<16x4xf32>
    %185 = arith.cmpf oeq, %181, %184 : vector<16x4xf32>
    %cst_59 = arith.constant 4.000000e+00 : f32
    %186 = vector.broadcast %cst_59 : f32 to vector<16x4xf32>
    %187 = arith.subf %186, %165 : vector<16x4xf32>
    %cst_60 = arith.constant 0.000000e+00 : f32
    %188 = vector.broadcast %cst_60 : f32 to vector<16x4xf32>
    %189 = arith.select %185, %187, %188 : vector<16x4xi1>, vector<16x4xf32>
    %cst_61 = arith.constant dense<0xFF800000> : vector<16xf32>
    %190 = vector.multi_reduction <maximumf>, %189, %cst_61 [1] : vector<16x4xf32> to vector<16xf32>
    %191 = vector.shape_cast %190 : vector<16xf32> to vector<16x1xf32>
    %cst_62 = arith.constant 4.000000e+00 : f32
    %192 = vector.broadcast %cst_62 : f32 to vector<16x1xf32>
    %193 = arith.subf %192, %191 : vector<16x1xf32>
    %194 = vector.broadcast %193 : vector<16x1xf32> to vector<16x4xf32>
    %195 = arith.cmpf oeq, %165, %194 : vector<16x4xf32>
    %196 = arith.addf %167, %183 : vector<16x1xf32>
    %197 = arith.divf %167, %196 : vector<16x1xf32>
    %cst_63 = arith.constant 0.000000e+00 : f32
    %198 = vector.shape_cast %197 : vector<16x1xf32> to vector<16x1xf32>
    %199 = vector.broadcast %198 : vector<16x1xf32> to vector<16x4xf32>
    %200 = vector.broadcast %cst_63 : f32 to vector<16x4xf32>
    %201 = arith.select %179, %199, %200 : vector<16x4xi1>, vector<16x4xf32>
    %202 = arith.divf %183, %196 : vector<16x1xf32>
    %cst_64 = arith.constant 0.000000e+00 : f32
    %203 = vector.shape_cast %202 : vector<16x1xf32> to vector<16x1xf32>
    %204 = vector.broadcast %203 : vector<16x1xf32> to vector<16x4xf32>
    %205 = vector.broadcast %cst_64 : f32 to vector<16x4xf32>
    %206 = arith.select %195, %204, %205 : vector<16x4xi1>, vector<16x4xf32>
    %207 = arith.addf %201, %206 : vector<16x4xf32>
    %208 = arith.ori %179, %195 : vector<16x4xi1>
    %209 = arith.extui %208 : vector<16x4xi1> to vector<16x4xi32>
    %210 = arith.sitofp %209 : vector<16x4xi32> to vector<16x4xf32>
    %cst_65 = arith.constant dense<0.000000e+00> : vector<4xf32>
    %211 = vector.multi_reduction <add>, %210, %cst_65 [0] : vector<16x4xf32> to vector<4xf32>
    %212 = vector.shape_cast %211 : vector<4xf32> to vector<1x4xf32>
    %cst_66 = arith.constant 8.000000e+00 : f32
    %213 = vector.broadcast %cst_66 : f32 to vector<1x4xf32>
    %214 = arith.subf %212, %213 : vector<1x4xf32>
    %215 = arith.mulf %214, %214 : vector<1x4xf32>
    %cst_67 = arith.constant dense<0.000000e+00> : vector<1xf32>
    %216 = vector.multi_reduction <add>, %215, %cst_67 [1] : vector<1x4xf32> to vector<1xf32>
    %217 = vector.shape_cast %216 : vector<1xf32> to vector<1x1xf32>
    %cst_68 = arith.constant 2.560000e+02 : f32
    %218 = vector.broadcast %cst_68 : f32 to vector<1x1xf32>
    %219 = arith.divf %217, %218 : vector<1x1xf32>
    %c0_69 = arith.constant 0 : index
    %c0_70 = arith.constant 0 : index
    %220 = vector.load %arg9[%c0_69, %c0_70] : memref<1x1xf32, #tpu.memory_space<vmem>>, vector<1x1xf32>
    tpu.vector_store %arg9[%c0_69, %c0_70], %219 {strides = array<i32>} : memref<1x1xf32, #tpu.memory_space<vmem>>, vector<1x1xf32>,
    %221 = tpu.iota {dimensions = array<i32: 0>} : vector<16x16xi32>
    %222 = tpu.iota {dimensions = array<i32: 1>} : vector<16x16xi32>
    %223 = arith.cmpi sle, %222, %221 : vector<16x16xi32>
    %224 = arith.extui %223 : vector<16x16xi1> to vector<16x16xi32>
    %225 = arith.sitofp %224 : vector<16x16xi32> to vector<16x16xf32>
    %cst_71 = arith.constant dense<0.000000e+00> : vector<16x4xf32>
    %226 = tpu.matmul %225, %210, %cst_71 {dimension_numbers = #tpu.dot_dimension_numbers<[1], [0], [0], [1], [0, 0, 1, 1], [], []>} : vector<16x16xf32>, vector<16x4xf32>, vector<16x4xf32> -> vector<16x4xf32>
    %cst_72 = arith.constant 4.000000e+00 : f32
    %227 = vector.broadcast %cst_72 : f32 to vector<16x4xf32>
    %228 = arith.cmpf ole, %226, %227 : vector<16x4xf32>
    %229 = arith.andi %208, %228 : vector<16x4xi1>
    %cst_73 = arith.constant 0.000000e+00 : f32
    %230 = vector.broadcast %cst_73 : f32 to vector<16x4xf32>
    %231 = arith.select %229, %207, %230 : vector<16x4xi1>, vector<16x4xf32>
    %c0_74 = arith.constant 0 : index
    %c0_75 = arith.constant 0 : index
    %232 = vector.load %arg4[%c0_74, %c0_75] : memref<32x256xf32, #tpu.memory_space<vmem>>, vector<32x256xf32>
    %cst_76 = arith.constant dense<0.000000e+00> : vector<16x256xf32>
    %233 = tpu.matmul %152, %232, %cst_76 {dimension_numbers = #tpu.dot_dimension_numbers<[1], [0], [0], [1], [0, 0, 1, 1], [], []>} : vector<16x32xf32>, vector<32x256xf32>, vector<16x256xf32> -> vector<16x256xf32>
    %c0_77 = arith.constant 0 : index
    %c0_78 = arith.constant 0 : index
    %234 = vector.load %arg5[%c0_77, %c0_78] : memref<1x256xf32, #tpu.memory_space<vmem>>, vector<1x256xf32>
    %235 = vector.broadcast %234 : vector<1x256xf32> to vector<16x256xf32>
    %236 = arith.addf %233, %235 : vector<16x256xf32>
    %cst_79 = arith.constant 5.000000e-01 : f32
    %237 = vector.broadcast %cst_79 : f32 to vector<16x256xf32>
    %238 = arith.mulf %237, %236 : vector<16x256xf32>
    %cst_80 = arith.constant 0.707106769 : f32
    %239 = vector.broadcast %cst_80 : f32 to vector<16x256xf32>
    %240 = arith.mulf %236, %239 : vector<16x256xf32>
    %241 = math.absf %240 : vector<16x256xf32>
    %cst_81 = arith.constant 0.327591091 : f32
    %242 = vector.broadcast %cst_81 : f32 to vector<16x256xf32>
    %243 = arith.mulf %242, %241 : vector<16x256xf32>
    %cst_82 = arith.constant 1.000000e+00 : f32
    %244 = vector.broadcast %cst_82 : f32 to vector<16x256xf32>
    %245 = arith.addf %244, %243 : vector<16x256xf32>
    %cst_83 = arith.constant 1.000000e+00 : f32
    %246 = vector.broadcast %cst_83 : f32 to vector<16x256xf32>
    %247 = arith.divf %246, %245 : vector<16x256xf32>
    %cst_84 = arith.constant 1.06140542 : f32
    %248 = vector.broadcast %cst_84 : f32 to vector<16x256xf32>
    %249 = arith.mulf %248, %247 : vector<16x256xf32>
    %cst_85 = arith.constant -1.45315206 : f32
    %250 = vector.broadcast %cst_85 : f32 to vector<16x256xf32>
    %251 = arith.addf %249, %250 : vector<16x256xf32>
    %252 = arith.mulf %251, %247 : vector<16x256xf32>
    %cst_86 = arith.constant 1.42141378 : f32
    %253 = vector.broadcast %cst_86 : f32 to vector<16x256xf32>
    %254 = arith.addf %252, %253 : vector<16x256xf32>
    %255 = arith.mulf %254, %247 : vector<16x256xf32>
    %cst_87 = arith.constant -0.284496725 : f32
    %256 = vector.broadcast %cst_87 : f32 to vector<16x256xf32>
    %257 = arith.addf %255, %256 : vector<16x256xf32>
    %258 = arith.mulf %257, %247 : vector<16x256xf32>
    %cst_88 = arith.constant 0.254829586 : f32
    %259 = vector.broadcast %cst_88 : f32 to vector<16x256xf32>
    %260 = arith.addf %258, %259 : vector<16x256xf32>
    %261 = arith.mulf %260, %247 : vector<16x256xf32>
    %262 = arith.mulf %241, %241 : vector<16x256xf32>
    %cst_89 = arith.constant 0.000000e+00 : f32
    %263 = vector.broadcast %cst_89 : f32 to vector<16x256xf32>
    %264 = arith.subf %263, %262 : vector<16x256xf32>
    %265 = math.exp %264 : vector<16x256xf32>
    %266 = arith.mulf %261, %265 : vector<16x256xf32>
    %cst_90 = arith.constant 1.000000e+00 : f32
    %267 = vector.broadcast %cst_90 : f32 to vector<16x256xf32>
    %268 = arith.subf %267, %266 : vector<16x256xf32>
    %cst_91 = arith.constant 0.000000e+00 : f32
    %269 = vector.broadcast %cst_91 : f32 to vector<16x256xf32>
    %270 = arith.cmpf oge, %240, %269 : vector<16x256xf32>
    %cst_92 = arith.constant 0.000000e+00 : f32
    %271 = vector.broadcast %cst_92 : f32 to vector<16x256xf32>
    %272 = arith.subf %271, %268 : vector<16x256xf32>
    %273 = arith.select %270, %268, %272 : vector<16x256xi1>, vector<16x256xf32>
    %cst_93 = arith.constant 1.000000e+00 : f32
    %274 = vector.broadcast %cst_93 : f32 to vector<16x256xf32>
    %275 = arith.addf %274, %273 : vector<16x256xf32>
    %276 = arith.mulf %238, %275 : vector<16x256xf32>
    %277 = tpu.iota {dimensions = array<i32: 0>} : vector<4x256xi32>
    %278 = tpu.iota {dimensions = array<i32: 1>} : vector<4x256xi32>
    %c64_i32 = arith.constant 64 : i32
    %279 = vector.broadcast %c64_i32 : i32 to vector<4x256xi32>
    %280 = arith.muli %277, %279 : vector<4x256xi32>
    %281 = arith.cmpi sge, %278, %280 : vector<4x256xi32>
    %c1_i32 = arith.constant 1 : i32
    %282 = vector.broadcast %c1_i32 : i32 to vector<4x256xi32>
    %283 = arith.addi %277, %282 : vector<4x256xi32>
    %c64_i32_94 = arith.constant 64 : i32
    %284 = vector.broadcast %c64_i32_94 : i32 to vector<4x256xi32>
    %285 = arith.muli %283, %284 : vector<4x256xi32>
    %286 = arith.cmpi slt, %278, %285 : vector<4x256xi32>
    %287 = arith.andi %281, %286 : vector<4x256xi1>
    %288 = arith.extui %287 : vector<4x256xi1> to vector<4x256xi32>
    %289 = arith.sitofp %288 : vector<4x256xi32> to vector<4x256xf32>
    %cst_95 = arith.constant dense<0.000000e+00> : vector<16x256xf32>
    %290 = tpu.matmul %231, %289, %cst_95 {dimension_numbers = #tpu.dot_dimension_numbers<[1], [0], [0], [1], [0, 0, 1, 1], [], []>} : vector<16x4xf32>, vector<4x256xf32>, vector<16x256xf32> -> vector<16x256xf32>
    %291 = arith.mulf %276, %290 : vector<16x256xf32>
    %c0_96 = arith.constant 0 : index
    %c0_97 = arith.constant 0 : index
    %292 = vector.load %arg6[%c0_96, %c0_97] : memref<256x32xf32, #tpu.memory_space<vmem>>, vector<256x32xf32>
    %cst_98 = arith.constant dense<0.000000e+00> : vector<16x32xf32>
    %293 = tpu.matmul %291, %292, %cst_98 {dimension_numbers = #tpu.dot_dimension_numbers<[1], [0], [0], [1], [0, 0, 1, 1], [], []>} : vector<16x256xf32>, vector<256x32xf32>, vector<16x32xf32> -> vector<16x32xf32>
    %c0_99 = arith.constant 0 : index
    %c0_100 = arith.constant 0 : index
    %294 = vector.load %arg7[%c0_99, %c0_100] : memref<4x32xf32, #tpu.memory_space<vmem>>, vector<4x32xf32>
    %cst_101 = arith.constant dense<0.000000e+00> : vector<16x32xf32>
    %295 = tpu.matmul %231, %294, %cst_101 {dimension_numbers = #tpu.dot_dimension_numbers<[1], [0], [0], [1], [0, 0, 1, 1], [], []>} : vector<16x4xf32>, vector<4x32xf32>, vector<16x32xf32> -> vector<16x32xf32>
    %296 = arith.addf %293, %295 : vector<16x32xf32>
    %297 = arith.addf %296, %130 : vector<16x32xf32>
    %298 = vector.shape_cast %297 : vector<16x32xf32> to vector<2x8x32xf32>
    %c0_102 = arith.constant 0 : index
    %c0_103 = arith.constant 0 : index
    %c0_104 = arith.constant 0 : index
    %299 = vector.load %arg8[%c0_102, %c0_103, %c0_104] : memref<2x8x32xf32, #tpu.memory_space<vmem>>, vector<2x8x32xf32>
    tpu.vector_store %arg8[%c0_102, %c0_103, %c0_104], %298 {strides = array<i32>} : memref<2x8x32xf32, #tpu.memory_space<vmem>>, vector<2x8x32xf32>,
    return
  }
}

</mosaic_0001>

<bundles_post_ra>
// kernel: moe_transformer_forward.1
= control target key start
LH: loop header
LB: loop body
LE: loop exit
PB: predicated region body
PF: predicated region fallthrough
CT: control target
= control target key end

     0   :  { %15 = vsyncpa [#allocation3], 0  ;;  %vm36_vm0 = vcmask 261120   ;;  %s4074_s0 = inlined_call_operand.vmem [shape: f32[2,8,32], index: 0, kind: input, shape index: {}]   ;;  %s4075_s1 = inlined_call_operand.vmem [shape: f32[8,32], index: 1, kind: input, shape index: {}]   ;;  %s4076_s2 = inlined_call_operand.vmem [shape: f32[4,32,32], index: 2, kind: input, shape index: {}]   ;;  %s4077_s3 = inlined_call_operand.vmem [shape: f32[32,4], index: 3, kind: input, shape index: {}]   ;;  %s4078_s4 = inlined_call_operand.vmem [shape: f32[32,256], index: 4, kind: input, shape index: {}]   ;;  %s4079_s5 = inlined_call_operand.vmem [shape: f32[1,256], index: 5, kind: input, shape index: {}]   ;;  %s4080_s6 = inlined_call_operand.vmem [shape: f32[256,32], index: 6, kind: input, shape index: {}]   ;;  %s4081_s7 = inlined_call_operand.vmem [shape: f32[4,32], index: 7, kind: input, shape index: {}]   ;;  %s4082_s8 = inlined_call_operand.hbm [shape: f32[2,8,32], index: 8, kind: output, shape index: {0}]   ;;  %s4083_s9 = inlined_call_operand.hbm [shape: f32[1,1], index: 9, kind: output, shape index: {1}]  }
   0x1   :  { %v3461_v0 = vld [vmem:[%s4074_s0] sm:$0xff]  ;;  %v3466_v1 = vld [vmem:[%s4074_s0 + $0x8] sm:$0xff] }
   0x2   :  { %16 = vsyncpa [#allocation5], 0  ;;  %v37_v2 = vsel %vm36_vm0, %v3461_v0, 0.0  ;;  %v40_v3 = vsel %vm36_vm0, %v3466_v1, 0.0  ;;  %v76_v14 = vld [vmem:[%s4076_s2] sm:$0xff]  ;;  %v77_v15 = vld [vmem:[%s4076_s2 + $0x8] sm:$0xff]  ;;  %v64_v25 = vlaneseq }
   0x3   :  { %38 = vadd.xlane.f32.xlu0 %v37_v2  ;;  %v78_v16 = vld [vmem:[%s4076_s2 + $0x10] sm:$0xff]  ;;  %v3190_v17 = vpack.c.bf16 %v77_v15, %v76_v14  ;;  %v79_v18 = vld [vmem:[%s4076_s2 + $0x18] sm:$0xff]  ;;  %v2851_v20 = vld [vmem:[%s4076_s2 + $0x20] sm:$0xff]  ;;  %v3398_v53 = vmov 0.0   ;;  %vm3399_vm1 = vmmov 0   ;;  %vm340_vm2 = vcmask 64512  }
   0x4   :  { %v3194_v19 = vpack.c.bf16 %v79_v18, %v78_v16  ;;  %v2852_v21 = vld [vmem:[%s4076_s2 + $0x28] sm:$0xff]  ;;  %v3495_v29 = vshrl.u32 %v64_v25, 7  ;;  %v3501_v32 = vld [vmem:[%s4075_s1] sm:$0xff]  ;;  %v2853_v42 = vld [vmem:[%s4076_s2 + $0x30] sm:$0xff]  ;;  %3072 = vmatprep.subr.mxu1 %v3398_v53  ;;  %3074 = vmatprep.mubr.msk.f32.mxu1 %vm3399_vm1, %v3398_v53  ;;  %s3400_s15 = smov 120   ;;  %s3401_s16 = smov 112  }
   0x5   :  { %3191 = vmatprep.subr.bf16.mxu0 %v3190_v17  ;;  %v3198_v22 = vpack.c.bf16 %v2852_v21, %v2851_v20  ;;  %v2854_v43 = vld [vmem:[%s4076_s2 + $0x38] sm:$0xff]  ;;  %v2857_v47 = vld [vmem:[%s4076_s2 + $0x40] sm:$0xff]  ;;  %v2858_v48 = vld [vmem:[%s4076_s2 + $0x48] sm:$0xff]  ;;  %s3402_s17 = smov 104   ;;  %vm2112_vm3 = vcmask 31744   ;;  %vm2228_vm11 = vcmask 130048  }
   0x6   :  { %3193 = vmatpush3.bf16.msra.mxu0 %v3190_v17  ;;  %v66_v31 = vsub.s32 0, %v3495_v29  ;;  %v72_v33 = vsub.s32 1, %v3495_v29  ;;  %v3202_v46 = vpack.c.bf16 %v2854_v43, %v2853_v42  ;;  %v3206_v49 = vpack.c.bf16 %v2858_v48, %v2857_v47  ;;  %v2859_v50 = vld [vmem:[%s4076_s2 + $0x50] sm:$0xff]  ;;  %v2860_v51 = vld [vmem:[%s4076_s2 + $0x58] sm:$0xff] }
   0x7   :  { %41 = vadd.xlane.f32.xlu0 %v40_v3  ;;  %3195 = vmatprep.subr.bf16.mxu0 %v3194_v19  ;;  %v3210_v52 = vpack.c.bf16 %v2860_v51, %v2859_v50  ;;  %v82_v54 = vsub.s32 4, %v3495_v29  ;;  %v174_v57 = vsub.s32 5, %v3495_v29  ;;  %v258_v3 = vsub.s32 6, %v3495_v29 }
   0x8   :  { %v67_v34 = vrot.slane %v3501_v32, %v66_v31  ;;  %v73_v37 = vrot.slane %v3501_v32, %v72_v33 }
   0x9   :  { %v83_v58 = vrot.slane %v3501_v32, %v82_v54  ;;  %v175_v59 = vrot.slane %v3501_v32, %v174_v57 }
   0xa   :  { %3197 = vmatpush3.bf16.msra.mxu0 %v3194_v19 }
   0xb   :  { %3199 = vmatprep.subr.bf16.mxu0 %v3198_v22 }
  0x90   :  { %v39_v4 = vpop.xlane.xlu0 %38 }
  0x91   :  { %v44_v5 = vmul.f32 0.03125, %v39_v4 }
  0x93   :  { %v46_v6 = vsub.f32 %v3461_v0, %v44_v5 }
  0x94   :  { %v42_v7 = vpop.xlane.xlu0 %41 }
  0x95   :  { %v45_v8 = vmul.f32 0.03125, %v42_v7  ;;  %v48_v9 = vmul.f32 %v46_v6, %v46_v6  ;;  %v259_v7 = vrot.slane %v3501_v32, %v258_v3 }
  0x97   :  { %v47_v10 = vsub.f32 %v3466_v1, %v45_v8  ;;  %v50_v11 = vsel %vm36_vm0, %v48_v9, 0.0 }
  0x98   :  { %51 = vadd.xlane.f32.xlu1 %v50_v11 }
  0x99   :  { %v49_v12 = vmul.f32 %v47_v10, %v47_v10 }
  0x9b   :  { %v53_v13 = vsel %vm36_vm0, %v49_v12, 0.0 }
  0x9c   :  { %54 = vadd.xlane.f32.xlu1 %v53_v13 }
 0x125   :  { %v52_v23 = vpop.xlane.xlu1 %51 }
 0x126   :  { %v56_v24 = vmul.f32 0.03125, %v52_v23 }
 0x128   :  { %v58_v26 = vadd.f32 1e-05, %v56_v24 }
 0x129   :  { %v55_v27 = vpop.xlane.xlu1 %54 }
 0x12a   :  { %3282 = vrsqrt.f32 %v58_v26  ;;  %v57_v28 = vmul.f32 0.03125, %v55_v27 }
 0x12c   :  { %v59_v30 = vadd.f32 1e-05, %v57_v28 }
 0x12e   :  { %3284 = vrsqrt.f32 %v59_v30 }
 0x134   :  { %v3283_v35 = vpop.eup %3282 }
 0x135   :  { %v62_v36 = vmul.f32 %v3283_v35, %v46_v6 }
 0x137   :  { %v68_v38 = vmul.f32 %v67_v34, %v62_v36 }
 0x138   :  { %v3285_v39 = vpop.eup %3284 }
 0x139   :  { %v74_v40 = vadd.f32 %v73_v37, %v68_v38  ;;  %v63_v41 = vmul.f32 %v3285_v39, %v47_v10 }
 0x13b   :  { %3042 = vmatprep.mubr.msk.f32.mxu0 %vm36_vm0, %v74_v40  ;;  %v69_v44 = vmul.f32 %v67_v34, %v63_v41 }
 0x13d   :  { %v75_v45 = vadd.f32 %v73_v37, %v69_v44 }
 0x13f   :  { %3043 = vmatmul.mubr.msk.f32.vlgmr.msra.gmra.mrb[0].mxu0 %vm36_vm0, %v75_v45 }
 0x140   :  { %3201 = vmatpush3.bf16.msra.mxu0 %v3198_v22  ;;  %3053 = vmatprep.mubr.msk.f32.mxu0 %vm36_vm0, %v74_v40 }
 0x141   :  { %3203 = vmatprep.subr.bf16.mxu0 %v3202_v46 }
 0x144   :  { %3205 = vmatpush3.bf16.msra.mxu0 %v3202_v46 }
 0x145   :  { %3207 = vmatprep.subr.bf16.mxu0 %v3206_v49 }
 0x147   :  { %3054 = vmatmul.mubr.msk.f32.vlgmr.msra.gmra.mrb[2].mxu0 %vm36_vm0, %v75_v45 }
 0x148   :  { %3209 = vmatpush3.bf16.msra.mxu0 %v3206_v49  ;;  %3064 = vmatprep.mubr.msk.f32.mxu0 %vm36_vm0, %v74_v40 }
 0x149   :  { %3211 = vmatprep.subr.bf16.mxu0 %v3210_v52 }
 0x14c   :  { %3213 = vmatpush3.bf16.msra.mxu0 %v3210_v52 }
 0x14d   :  { %3067 = vmatprep.subr.mxu0 %v3398_v53 }
 0x14f   :  { %3065 = vmatmul.mubr.msk.f32.vlgmr.msra.gmra.mrb[4].mxu0 %vm36_vm0, %v75_v45 }
 0x150   :  { %3069 = vmatprep.mubr.msk.f32.mxu0 %vm3399_vm1, %v3398_v53 }
 0x212   :  { %v3044_v55 = vpop.f32.mrb[0].mxu0 }
 0x213   :  { %v156_v56 = vpop.f32.mrb[1].mxu0  ;;  %v162_v60 = vadd.f32 %v3044_v55, %v83_v58 }
 0x214   :  { %v157_v62 = vadd.f32 %v156_v56, %v83_v58 }
 0x215   :  { %v3551_v5 = vmul.f32 0.35355338, %v162_v60 }
 0x216   :  { %v3556_v6 = vmul.f32 0.35355338, %v157_v62 }
 0x21a   :  { %v3055_v61 = vpop.f32.mrb[2].mxu0 }
 0x21b   :  { %v3544_v63 = vadd.f32 %v3055_v61, %v175_v59  ;;  %v242_v2 = vpop.f32.mrb[3].mxu0 }
 0x21c   :  { %v3547_v4 = vadd.f32 %v242_v2, %v175_v59 }
 0x21d   :  { %3073 = vmatpush3.xpose.msk.msra.mxu1 %vm340_vm2, %v3544_v63 }
 0x21e   :  { %3068 = vmatpush3.xpose.msk.msra.mxu0 %vm340_vm2, %v3547_v4  ;;  %3082 = vmatprep.subr.mxu1 %v3398_v53 }
 0x21f   :  { %3077 = vmatprep.subr.mxu0 %v3398_v53 }
 0x220   :  { %3075 = vmatmul.mubr.msk.f32.vlgmr.msra.gmra.mrb[0].mxu1 %vm340_vm2, %v3551_v5 }
 0x221   :  { %3070 = vmatmul.mubr.msk.f32.vlgmr.msra.gmra.mrb[6].mxu0 %vm340_vm2, %v3556_v6  ;;  %3084 = vmatprep.mubr.msk.f32.mxu1 %vm3399_vm1, %v3398_v53 }
 0x222   :  { %v3066_v8 = vpop.f32.mrb[4].mxu0  ;;  %3079 = vmatprep.mubr.msk.f32.mxu0 %vm3399_vm1, %v3398_v53 }
 0x223   :  { %v3568_v9 = vadd.f32 %v3066_v8, %v259_v7  ;;  %v326_v10 = vpop.f32.mrb[5].mxu0 }
 0x224   :  { %v3570_v11 = vadd.f32 %v326_v10, %v259_v7 }
 0x225   :  { %3083 = vmatpush3.msra.mxu1 %v3568_v9 }
 0x226   :  { %3078 = vmatpush3.msra.mxu0 %v3570_v11  ;;  %3092 = vmatprep.subr.mxu1 %v3398_v53 }
 0x227   :  { %3087 = vmatprep.subr.mxu0 %v3398_v53 }
 0x2f3   :  { %v489_v12 = vpop.f32.mrb[0].mxu1 }
 0x2f4   :  { %v413_v13 = vpop.f32.mrb[6].mxu0  ;;  %v3076_v14 = vpop.f32.mrb[1].mxu1  ;;  %v496_v15 = vsel %vm340_vm2, %v489_v12, -inf }
 0x2f5   :  { %497 = vmax.xlane.f32.xlu0 %v496_v15  ;;  %v3071_v16 = vpop.f32.mrb[7].mxu0  ;;  %v493_v22 = vsel %vm340_vm2, %v413_v13, -inf }
 0x30b   :  { %741 = vrot.lane.b32.xlu0 %v3544_v63, %s3400_s15 }
 0x382   :  { %v498_v17 = vpop.xlane.xlu0 %497 }
 0x383   :  { %v500_v18 = vsub.f32 %v489_v12, %v498_v17 }
 0x385   :  { %v503_v19 = vmul.f32 1.442695, %v500_v18 }
 0x386   :  { %v742_v27 = vpop.permute.xlu0 %741 }
 0x387   :  { %3286 = vpow2.f32 %v503_v19 }
 0x391   :  { %v3287_v20 = vpop.eup %3286 }
 0x392   :  { %v508_v21 = vsel %vm340_vm2, %v3287_v20, 0.0 }
 0x393   :  { %509 = vadd.xlane.f32.xlu1 %v508_v21 }
 0x3a4   :  { %739 = vrot.lane.b32.xlu1 %v3551_v5, %s3400_s15 }
 0x3c8   :  { %494 = vmax.xlane.f32.xlu1 %v493_v22 }
 0x3d9   :  { %661 = vrot.lane.b32.xlu1 %v3556_v6, %s3400_s15 }
 0x420   :  { %v510_v23 = vpop.xlane.xlu1 %509 }
 0x421   :  { %3288 = vrcp.f32 %v510_v23 }
 0x424   :  { %v740_v28 = vpop.permute.xlu1 %739 }
 0x42b   :  { %v3289_v24 = vpop.eup %3288 }
 0x42c   :  { %v514_v26 = vmul.f32 %v3289_v24, %v3287_v20 }
 0x42e   :  { %3085 = vmatmul.mubr.msk.f32.vlgmr.msra.gmra.mrb[2].mxu1 %vm340_vm2, %v514_v26 }
 0x42f   :  { %3093 = vmatpush3.xpose.msk.msra.mxu1 %vm340_vm2, %v742_v27  ;;  %3094 = vmatprep.mubr.msk.f32.mxu1 %vm3399_vm1, %v3398_v53  ;;  %v2864_v27 = vld [vmem:[%s4076_s2 + $0x68] sm:$0xff] }
 0x430   :  { %3102 = vmatprep.subr.mxu1 %v3398_v53 }
 0x432   :  { %3095 = vmatmul.mubr.msk.f32.vlgmr.msra.gmra.mrb[4].mxu1 %vm340_vm2, %v740_v28  ;;  %v2863_v28 = vld [vmem:[%s4076_s2 + $0x60] sm:$0xff] }
 0x433   :  { %3104 = vmatprep.mubr.msk.f32.mxu1 %vm3399_vm1, %v3398_v53 }
 0x455   :  { %v495_v30 = vpop.xlane.xlu1 %494 }
 0x456   :  { %v499_v34 = vsub.f32 %v413_v13, %v495_v30 }
 0x458   :  { %v501_v35 = vmul.f32 1.442695, %v499_v34 }
 0x459   :  { %v662_v44 = vpop.permute.xlu1 %661 }
 0x45a   :  { %3290 = vpow2.f32 %v501_v35 }
 0x464   :  { %v3291_v36 = vpop.eup %3290 }
 0x465   :  { %v505_v37 = vsel %vm340_vm2, %v3291_v36, 0.0 }
 0x466   :  { %506 = vadd.xlane.f32.xlu0 %v505_v37 }
 0x47c   :  { %663 = vrot.lane.b32.xlu0 %v3547_v4, %s3400_s15 }
 0x4f3   :  { %v507_v38 = vpop.xlane.xlu0 %506 }
 0x4f4   :  { %3292 = vrcp.f32 %v507_v38 }
 0x4f7   :  { %v664_v41 = vpop.permute.xlu0 %663 }
 0x4fe   :  { %v3293_v39 = vpop.eup %3292 }
 0x4ff   :  { %v512_v40 = vmul.f32 %v3293_v39, %v3291_v36 }
 0x501   :  { %3080 = vmatmul.mubr.msk.f32.vlgmr.msra.gmra.mrb[8].mxu0 %vm340_vm2, %v512_v40  ;;  %v3597_v42 = vpop.f32.mrb[2].mxu1 }
 0x502   :  { %3088 = vmatpush3.xpose.msk.msra.mxu0 %vm340_vm2, %v664_v41  ;;  %v3086_v43 = vpop.f32.mrb[3].mxu1  ;;  %3089 = vmatprep.mubr.msk.f32.mxu0 %vm3399_vm1, %v3398_v53 }
 0x503   :  { %3097 = vmatprep.subr.mxu0 %v3398_v53 }
 0x505   :  { %3090 = vmatmul.mubr.msk.f32.vlgmr.msra.gmra.mrb[10].mxu0 %vm340_vm2, %v662_v44  ;;  %v813_v45 = vpop.f32.mrb[4].mxu1 }
 0x506   :  { %v3096_v46 = vpop.f32.mrb[5].mxu1  ;;  %v820_v47 = vsel %vm340_vm2, %v813_v45, -inf  ;;  %3099 = vmatprep.mubr.msk.f32.mxu0 %vm3399_vm1, %v3398_v53 }
 0x507   :  { %821 = vmax.xlane.f32.xlu1 %v820_v47  ;;  %v2865_v47 = vld [vmem:[%s4076_s2 + $0x70] sm:$0xff] }
 0x518   :  { %1157 = vrot.lane.b32.xlu1 %v3547_v4, %s3401_s16 }
 0x51c   :  { %1155 = vrot.lane.b32.xlu1 %v3556_v6, %s3401_s16 }
 0x520   :  { %1235 = vrot.lane.b32.xlu1 %v3544_v63, %s3401_s16 }
 0x594   :  { %v822_v48 = vpop.xlane.xlu1 %821 }
 0x595   :  { %v824_v49 = vsub.f32 %v813_v45, %v822_v48 }
 0x597   :  { %v827_v50 = vmul.f32 1.442695, %v824_v49 }
 0x598   :  { %v1158_v61 = vpop.permute.xlu1 %1157 }
 0x599   :  { %3294 = vpow2.f32 %v827_v50 }
 0x59c   :  { %v1156_v2 = vpop.permute.xlu1 %1155 }
 0x5a0   :  { %v1236_v7 = vpop.permute.xlu1 %1235 }
 0x5a3   :  { %v3295_v51 = vpop.eup %3294 }
 0x5a4   :  { %v832_v52 = vsel %vm340_vm2, %v3295_v51, 0.0 }
 0x5a5   :  { %833 = vadd.xlane.f32.xlu0 %v832_v52 }
 0x5bb   :  { %917 = vrot.lane.b32.xlu0 %v3568_v9, %s3400_s15 }
 0x5bf   :  { %1233 = vrot.lane.b32.xlu0 %v3551_v5, %s3401_s16 }
 0x5d4   :  { %v3618_v54 = vpop.f32.mrb[8].mxu0 }
 0x5d5   :  { %v3081_v55 = vpop.f32.mrb[9].mxu0 }
 0x5d8   :  { %v735_v56 = vpop.f32.mrb[10].mxu0 }
 0x5d9   :  { %v3091_v57 = vpop.f32.mrb[11].mxu0  ;;  %v817_v58 = vsel %vm340_vm2, %v735_v56, -inf }
 0x5da   :  { %818 = vmax.xlane.f32.xlu1 %v817_v58 }
 0x632   :  { %v834_v59 = vpop.xlane.xlu0 %833 }
 0x633   :  { %3296 = vrcp.f32 %v834_v59 }
 0x636   :  { %v918_v60 = vpop.permute.xlu0 %917 }
 0x637   :  { %3103 = vmatpush3.msra.mxu1 %v918_v60 }
 0x638   :  { %3117 = vmatprep.subr.mxu1 %v3398_v53 }
 0x63a   :  { %v1234_v8 = vpop.permute.xlu0 %1233 }
 0x63d   :  { %v3297_v62 = vpop.eup %3296 }
 0x63e   :  { %v838_v3 = vmul.f32 %v3297_v62, %v3295_v51 }
 0x640   :  { %3105 = vmatmul.mubr.msk.f32.vlgmr.msra.gmra.mrb[6].mxu1 %vm340_vm2, %v838_v3 }
 0x641   :  { %3118 = vmatpush3.xpose.msk.msra.mxu1 %vm340_vm2, %v1158_v61  ;;  %3119 = vmatprep.mubr.msk.f32.mxu1 %vm3399_vm1, %v3398_v53 }
 0x642   :  { %3122 = vmatprep.subr.mxu1 %v3398_v53 }
 0x644   :  { %3120 = vmatmul.mubr.msk.f32.vlgmr.msra.gmra.mrb[8].mxu1 %vm340_vm2, %v1156_v2 }
 0x645   :  { %3123 = vmatpush3.xpose.msk.msra.mxu1 %vm340_vm2, %v1236_v7  ;;  %3124 = vmatprep.mubr.msk.f32.mxu1 %vm3399_vm1, %v3398_v53 }
 0x646   :  { %3132 = vmatprep.subr.mxu1 %v3398_v53 }
 0x648   :  { %3125 = vmatmul.mubr.msk.f32.vlgmr.msra.gmra.mrb[10].mxu1 %vm340_vm2, %v1234_v8 }
 0x649   :  { %3134 = vmatprep.mubr.msk.f32.mxu1 %vm3399_vm1, %v3398_v53 }
 0x667   :  { %v819_v10 = vpop.xlane.xlu1 %818 }
 0x668   :  { %v823_v12 = vsub.f32 %v735_v56, %v819_v10 }
 0x66a   :  { %v825_v13 = vmul.f32 1.442695, %v823_v12 }
 0x66c   :  { %3298 = vpow2.f32 %v825_v13 }
 0x676   :  { %v3299_v14 = vpop.eup %3298 }
 0x677   :  { %v829_v15 = vsel %vm340_vm2, %v3299_v14, 0.0 }
 0x678   :  { %830 = vadd.xlane.f32.xlu0 %v829_v15 }
 0x68e   :  { %840 = vrot.lane.b32.xlu0 %v3570_v11, %s3400_s15 }
 0x692   :  { %1409 = vrot.lane.b32.xlu0 %v3568_v9, %s3401_s16 }
 0x696   :  { %1570 = vrot.lane.b32.xlu0 %v3547_v4, %s3402_s17 }
 0x69a   :  { %1648 = vrot.lane.b32.xlu0 %v3544_v63, %s3402_s17 }
 0x69e   :  { %1568 = vrot.lane.b32.xlu0 %v3556_v6, %s3402_s17 }
 0x705   :  { %v831_v16 = vpop.xlane.xlu0 %830 }
 0x706   :  { %3300 = vrcp.f32 %v831_v16 }
 0x709   :  { %v841_v17 = vpop.permute.xlu0 %840 }
 0x70a   :  { %3098 = vmatpush3.msra.mxu0 %v841_v17 }
 0x70b   :  { %3107 = vmatprep.subr.mxu0 %v2864_v27 }
 0x70d   :  { %v1410_v18 = vpop.permute.xlu0 %1409 }
 0x70e   :  { %3133 = vmatpush3.msra.mxu1 %v1410_v18 }
 0x70f   :  { %3142 = vmatprep.subr.mxu1 %v3398_v53 }
 0x710   :  { %v3301_v19 = vpop.eup %3300 }
 0x711   :  { %v836_v20 = vmul.f32 %v3301_v19, %v3299_v14  ;;  %v1571_v49 = vpop.permute.xlu0 %1570 }
 0x713   :  { %3100 = vmatmul.mubr.msk.f32.vlgmr.msra.gmra.mrb[12].mxu0 %vm340_vm2, %v836_v20  ;;  %v989_v21 = vpop.f32.mrb[6].mxu1 }
 0x714   :  { %v3106_v4 = vpop.f32.mrb[7].mxu1  ;;  %3108 = vmatpush3.msra.mxu0 %v2864_v27 }
 0x715   :  { %3112 = vmatprep.subr.mxu0 %v2863_v28  ;;  %v1649_v52 = vpop.permute.xlu0 %1648 }
 0x717   :  { %v1229_v22 = vpop.f32.mrb[8].mxu1 }
 0x718   :  { %v3121_v23 = vpop.f32.mrb[9].mxu1  ;;  %v1311_v63 = vsel %vm340_vm2, %v1229_v22, -inf }
 0x719   :  { %1312 = vmax.xlane.f32.xlu1 %v1311_v63  ;;  %v1569_v55 = vpop.permute.xlu0 %1568 }
 0x71b   :  { %v1307_v6 = vpop.f32.mrb[10].mxu1 }
 0x71c   :  { %v3126_v24 = vpop.f32.mrb[11].mxu1  ;;  %v1314_v26 = vsel %vm340_vm2, %v1307_v6, -inf }
 0x71d   :  { %1315 = vmax.xlane.f32.xlu1 %v1314_v26  ;;  %v2866_v26 = vld [vmem:[%s4076_s2 + $0x78] sm:$0xff] }
 0x7a6   :  { %v1313_v30 = vpop.xlane.xlu1 %1312 }
 0x7a7   :  { %v1317_v34 = vsub.f32 %v1229_v22, %v1313_v30 }
 0x7a9   :  { %v1319_v35 = vmul.f32 1.442695, %v1317_v34  ;;  %v1983_v34 = vsub.s32 7, %v3495_v29 }
 0x7aa   :  { %v1316_v36 = vpop.xlane.xlu1 %1315 }
 0x7ab   :  { %3302 = vpow2.f32 %v1319_v35  ;;  %v1318_v37 = vsub.f32 %v1307_v6, %v1316_v36  ;;  %v1984_v35 = vrot.slane %v3501_v32, %v1983_v34 }
 0x7ad   :  { %v1321_v38 = vmul.f32 1.442695, %v1318_v37 }
 0x7af   :  { %3304 = vpow2.f32 %v1321_v38 }
 0x7b5   :  { %v3303_v39 = vpop.eup %3302 }
 0x7b6   :  { %v1323_v40 = vsel %vm340_vm2, %v3303_v39, 0.0 }
 0x7b7   :  { %1324 = vadd.xlane.f32.xlu1 %v1323_v40 }
 0x7b9   :  { %v3305_v41 = vpop.eup %3304 }
 0x7ba   :  { %v1326_v43 = vsel %vm340_vm2, %v3305_v41, 0.0 }
 0x7bb   :  { %1327 = vadd.xlane.f32.xlu1 %v1326_v43 }
 0x7cc   :  { %1333 = vrot.lane.b32.xlu1 %v3570_v11, %s3401_s16 }
 0x7d0   :  { %1646 = vrot.lane.b32.xlu1 %v3551_v5, %s3402_s17 }
 0x7e6   :  { %v912_v44 = vpop.f32.mrb[12].mxu0 }
 0x7e7   :  { %v3101_v45 = vpop.f32.mrb[13].mxu0  ;;  %3109 = vmatprep.mubr.msk.f32.mxu0 %vm340_vm2, %v912_v44 }
 0x7e8   :  { %3110 = vmatmul.mubr.msk.f32.vlgmr.msra.gmra.mrb[14].mxu0 %vm340_vm2, %v989_v21 }
 0x7e9   :  { %3114 = vmatprep.mubr.msk.f32.mxu0 %vm340_vm2, %v3618_v54  ;;  %3113 = vmatpush3.msra.mxu0 %v2863_v28 }
 0x7ea   :  { %3127 = vmatprep.subr.mxu0 %v3398_v53 }
 0x7f0   :  { %3115 = vmatmul.mubr.msk.f32.vlgmr.msra.gmra.mrb[14].mxu0 %vm340_vm2, %v3597_v42 }
 0x7f1   :  { %3129 = vmatprep.mubr.msk.f32.mxu0 %vm3399_vm1, %v3398_v53 }
 0x844   :  { %v1325_v46 = vpop.xlane.xlu1 %1324 }
 0x845   :  { %3306 = vrcp.f32 %v1325_v46 }
 0x848   :  { %v1328_v5 = vpop.xlane.xlu1 %1327 }
 0x849   :  { %3308 = vrcp.f32 %v1328_v5 }
 0x84c   :  { %v1334_v48 = vpop.permute.xlu1 %1333 }
 0x84d   :  { %3128 = vmatpush3.msra.mxu0 %v1334_v48 }
 0x84e   :  { %3137 = vmatprep.subr.mxu0 %v2865_v47 }
 0x84f   :  { %v3307_v50 = vpop.eup %3306 }
 0x850   :  { %v1330_v51 = vmul.f32 %v3307_v50, %v3303_v39  ;;  %v1647_v60 = vpop.permute.xlu1 %1646 }
 0x852   :  { %3130 = vmatmul.mubr.msk.f32.vlgmr.msra.gmra.mrb[16].mxu0 %vm340_vm2, %v1330_v51 }
 0x853   :  { %v3309_v42 = vpop.eup %3308  ;;  %3138 = vmatpush3.msra.mxu0 %v2865_v47 }
 0x854   :  { %v1332_v54 = vmul.f32 %v3309_v42, %v3305_v41  ;;  %3147 = vmatprep.subr.mxu0 %v3398_v53  ;;  %v2027_v42 = vld [vmem:[%s4077_s3] sm:$0xff] }
 0x856   :  { %3135 = vmatmul.mubr.msk.f32.vlgmr.msra.gmra.mrb[12].mxu1 %vm340_vm2, %v1332_v54 }
 0x857   :  { %3143 = vmatpush3.xpose.msk.msra.mxu1 %vm340_vm2, %v1571_v49  ;;  %3144 = vmatprep.mubr.msk.f32.mxu1 %vm3399_vm1, %v3398_v53 }
 0x858   :  { %3152 = vmatprep.subr.mxu1 %v3398_v53 }
 0x85a   :  { %3145 = vmatmul.mubr.msk.f32.vlgmr.msra.gmra.mrb[14].mxu1 %vm340_vm2, %v1569_v55  ;;  %v2029_v55 = vld [vmem:[%s4077_s3 + $0x10] sm:$0xff] }
 0x85b   :  { %3154 = vmatprep.mubr.msk.f32.mxu1 %vm3399_vm1, %v3398_v53 }
 0x925   :  { %v1405_v56 = vpop.f32.mrb[16].mxu0 }
 0x926   :  { %v3131_v57 = vpop.f32.mrb[17].mxu0  ;;  %3139 = vmatprep.mubr.msk.f32.mxu0 %vm340_vm2, %v1405_v56  ;;  %v2030_v56 = vld [vmem:[%s4077_s3 + $0x18] sm:$0xff] }
 0x927   :  { %v3218_v57 = vpack.c.bf16 %v2030_v56, %v2029_v55 }
 0x929   :  { %v1481_v58 = vpop.f32.mrb[12].mxu1 }
 0x92a   :  { %v3136_v59 = vpop.f32.mrb[13].mxu1  ;;  %3140 = vmatmul.mubr.msk.f32.vlgmr.msra.gmra.mrb[14].mxu0 %vm340_vm2, %v1481_v58  ;;  %v2317_v58 = vld [vmem:[%s4078_s4 + $0x8] sm:$0xff] }
 0x92b   :  { %3148 = vmatpush3.xpose.msk.msra.mxu0 %vm340_vm2, %v1649_v52  ;;  %3149 = vmatprep.mubr.msk.f32.mxu0 %vm3399_vm1, %v3398_v53  ;;  %v2028_v52 = vld [vmem:[%s4077_s3 + $0x8] sm:$0xff]  ;;  %v2319_v59 = vld [vmem:[%s4078_s4 + $0x18] sm:$0xff] }
 0x92c   :  { %3157 = vmatprep.subr.mxu0 %v3398_v53  ;;  %v3214_v54 = vpack.c.bf16 %v2028_v52, %v2027_v42 }
 0x92d   :  { %v1642_v61 = vpop.f32.mrb[14].mxu1 }
 0x92e   :  { %v3146_v62 = vpop.f32.mrb[15].mxu1  ;;  %3150 = vmatmul.mubr.msk.f32.vlgmr.msra.gmra.mrb[18].mxu0 %vm340_vm2, %v1647_v60  ;;  %v1724_v2 = vsel %vm340_vm2, %v1642_v61, -inf  ;;  %v3226_v60 = vpack.c.bf16 %v2319_v59, %v2317_v58 }
 0x92f   :  { %1725 = vmax.xlane.f32.xlu0 %v1724_v2  ;;  %3159 = vmatprep.mubr.msk.f32.mxu0 %vm3399_vm1, %v3398_v53 }
 0x9bc   :  { %v1726_v3 = vpop.xlane.xlu0 %1725 }
 0x9bd   :  { %v1730_v7 = vsub.f32 %v1642_v61, %v1726_v3 }
 0x9bf   :  { %v1732_v8 = vmul.f32 1.442695, %v1730_v7 }
 0x9c1   :  { %3310 = vpow2.f32 %v1732_v8 }
 0x9cb   :  { %v3311_v10 = vpop.eup %3310 }
 0x9cc   :  { %v1736_v12 = vsel %vm340_vm2, %v3311_v10, 0.0 }
 0x9cd   :  { %1737 = vadd.xlane.f32.xlu0 %v1736_v12  ;;  %v2023_v12 = vsub.s32 3, %v3495_v29 }
 0xa01   :  { %v1720_v13 = vpop.f32.mrb[18].mxu0 }
 0xa02   :  { %v3151_v14 = vpop.f32.mrb[19].mxu0  ;;  %v1727_v15 = vsel %vm340_vm2, %v1720_v13, -inf }
 0xa03   :  { %1728 = vmax.xlane.f32.xlu1 %v1727_v15 }
 0xa14   :  { %1822 = vrot.lane.b32.xlu1 %v3568_v9, %s3402_s17 }
 0xa5a   :  { %v1738_v4 = vpop.xlane.xlu0 %1737 }
 0xa90   :  { %v1729_v16 = vpop.xlane.xlu1 %1728 }
 0xa91   :  { %v1731_v17 = vsub.f32 %v1720_v13, %v1729_v16 }
 0xa93   :  { %v1734_v18 = vmul.f32 1.442695, %v1731_v17 }
 0xa94   :  { %v1823_v19 = vpop.permute.xlu1 %1822 }
 0xa95   :  { %3312 = vpow2.f32 %v1734_v18  ;;  %3158 = vmatpush3.msra.mxu0 %v1823_v19  ;;  %v2024_v18 = vrot.slane %v3501_v32, %v2023_v12 }
 0xa96   :  { %3314 = vrcp.f32 %v1738_v4  ;;  %3162 = vmatprep.subr.mxu0 %v2866_v26 }
 0xa9f   :  { %v3313_v20 = vpop.eup %3312 }
 0xaa0   :  { %v1739_v21 = vsel %vm340_vm2, %v3313_v20, 0.0  ;;  %v3315_v23 = vpop.eup %3314 }
 0xaa1   :  { %1740 = vadd.xlane.f32.xlu0 %v1739_v21  ;;  %v1743_v63 = vmul.f32 %v3315_v23, %v3311_v10  ;;  %v2017_v10 = vsub.s32 2, %v3495_v29  ;;  %v2318_v21 = vld [vmem:[%s4078_s4 + $0x10] sm:$0xff]  ;;  %v2323_v23 = vld [vmem:[%s4078_s4 + $0x38] sm:$0xff] }
 0xaa3   :  { %v2018_v13 = vrot.slane %v3501_v32, %v2017_v10 }
 0xab7   :  { %1746 = vrot.lane.b32.xlu0 %v3570_v11, %s3402_s17 }
 0xb2e   :  { %v1741_v22 = vpop.xlane.xlu0 %1740 }
 0xb2f   :  { %3316 = vrcp.f32 %v1741_v22  ;;  %v2321_v22 = vld [vmem:[%s4078_s4 + $0x28] sm:$0xff] }
 0xb32   :  { %v1747_v9 = vpop.permute.xlu0 %1746 }
 0xb33   :  { %3153 = vmatpush3.msra.mxu1 %v1747_v9 }
 0xb34   :  { %3155 = vmatmul.mubr.msk.f32.vlgmr.msra.gmra.mrb[16].mxu1 %vm340_vm2, %v1743_v63  ;;  %3215 = vmatprep.subr.bf16.mxu1 %v3214_v54 }
 0xb35   :  { %3217 = vmatpush3.bf16.msra.mxu1 %v3214_v54 }
 0xb36   :  { %3219 = vmatprep.subr.bf16.mxu1 %v3218_v57 }
 0xb39   :  { %v3317_v6 = vpop.eup %3316  ;;  %3221 = vmatpush3.bf16.msra.mxu1 %v3218_v57  ;;  %v3785_v57 = vand.u32 127, %v64_v25 }
 0xb3a   :  { %v1745_v24 = vmul.f32 %v3317_v6, %v3313_v20  ;;  %3227 = vmatprep.subr.bf16.mxu1 %v3226_v60  ;;  %v2316_v20 = vld [vmem:[%s4078_s4] sm:$0xff]  ;;  %v3230_v6 = vpack.c.bf16 %v2323_v23, %v2321_v22 }
 0xb3b   :  { %v3228_v32 = vpack.c.bf16 %v2318_v21, %v2316_v20  ;;  %v2137_v58 = vcvt.s32.f32 %v3785_v57  ;;  %vm2222_vm10 = vcmp.le.s32.totalorder %v3785_v57, %v3495_v29 }
 0xb3c   :  { %3160 = vmatmul.mubr.msk.f32.vlgmr.msra.gmra.mrb[20].mxu0 %vm340_vm2, %v1745_v24  ;;  %v2320_v24 = vld [vmem:[%s4078_s4 + $0x20] sm:$0xff] }
 0xb3d   :  { %3163 = vmatpush3.msra.mxu0 %v2866_v26  ;;  %v2322_v26 = vld [vmem:[%s4078_s4 + $0x30] sm:$0xff]  ;;  %v2146_v59 = vsub.f32 4.0, %v2137_v58 }
 0xc07   :  { %v1818_v11 = vpop.f32.mrb[16].mxu1 }
 0xc08   :  { %v3156_v27 = vpop.f32.mrb[17].mxu1  ;;  %3164 = vmatprep.mubr.msk.f32.mxu0 %vm340_vm2, %v1818_v11  ;;  %v3232_v11 = vpack.c.bf16 %v2322_v26, %v2320_v24  ;;  %v2221_v24 = vadd.s32 8, %v3495_v29 }
 0xc0a   :  { %vm2223_vm1 = vcmp.le.s32.totalorder %v3785_v57, %v2221_v24 }
 0xc0f   :  { %v1894_v28 = vpop.f32.mrb[20].mxu0 }
 0xc10   :  { %v3161_v30 = vpop.f32.mrb[21].mxu0  ;;  %3165 = vmatmul.mubr.msk.f32.vlgmr.msra.gmra.mrb[14].mxu0 %vm340_vm2, %v1894_v28 }
 0xce3   :  { %v3166_v36 = vpop.f32.mrb[14].mxu0 }
 0xce4   :  { %v1986_v37 = vadd.f32 %v3166_v36, %v1984_v35  ;;  %v1970_v38 = vpop.f32.mrb[15].mxu0 }
 0xce5   :  { %v1985_v39 = vadd.f32 %v1984_v35, %v1970_v38 }
 0xce6   :  { %v3711_v40 = vadd.f32 %v1986_v37, %v3466_v1 }
 0xce7   :  { %v3714_v41 = vadd.f32 %v1985_v39, %v3461_v0 }
 0xce8   :  { %v1992_v43 = vsel %vm36_vm0, %v3711_v40, 0.0 }
 0xce9   :  { %1993 = vadd.xlane.f32.xlu0 %v1992_v43  ;;  %v1989_v44 = vsel %vm36_vm0, %v3714_v41, 0.0 }
 0xcea   :  { %1990 = vadd.xlane.f32.xlu1 %v1989_v44 }
 0xd76   :  { %v1994_v45 = vpop.xlane.xlu0 %1993 }
 0xd77   :  { %v1996_v46 = vmul.f32 0.03125, %v1994_v45  ;;  %v1991_v5 = vpop.xlane.xlu1 %1990 }
 0xd78   :  { %v1995_v47 = vmul.f32 0.03125, %v1991_v5 }
 0xd79   :  { %v1998_v48 = vsub.f32 %v3711_v40, %v1996_v46 }
 0xd7a   :  { %v1997_v1 = vsub.f32 %v3714_v41, %v1995_v47 }
 0xd7b   :  { %v2000_v49 = vmul.f32 %v1998_v48, %v1998_v48 }
 0xd7c   :  { %v1999_v50 = vmul.f32 %v1997_v1, %v1997_v1 }
 0xd7d   :  { %v2004_v0 = vsel %vm36_vm0, %v2000_v49, 0.0 }
 0xd7e   :  { %2005 = vadd.xlane.f32.xlu1 %v2004_v0  ;;  %v2001_v51 = vsel %vm36_vm0, %v1999_v50, 0.0 }
 0xd7f   :  { %2002 = vadd.xlane.f32.xlu0 %v2001_v51 }
 0xe0b   :  { %v2006_v61 = vpop.xlane.xlu1 %2005 }
 0xe0c   :  { %v2008_v62 = vmul.f32 0.03125, %v2006_v61  ;;  %v2003_v2 = vpop.xlane.xlu0 %2002 }
 0xe0d   :  { %v2007_v3 = vmul.f32 0.03125, %v2003_v2 }
 0xe0e   :  { %v2010_v7 = vadd.f32 1e-05, %v2008_v62 }
 0xe0f   :  { %v2009_v8 = vadd.f32 1e-05, %v2007_v3 }
 0xe10   :  { %3318 = vrsqrt.f32 %v2010_v7 }
 0xe11   :  { %3320 = vrsqrt.f32 %v2009_v8 }
 0xe1a   :  { %v3319_v14 = vpop.eup %3318 }
 0xe1b   :  { %v3321_v15 = vpop.eup %3320  ;;  %v2014_v16 = vmul.f32 %v3319_v14, %v1998_v48  ;;  %v2660_v14 = vld [vmem:[%s4080_s6 + $0xf8] sm:$0xff] }
 0xe1c   :  { %v2013_v17 = vmul.f32 %v3321_v15, %v1997_v1 }
 0xe1d   :  { %v2020_v19 = vmul.f32 %v2018_v13, %v2014_v16 }
 0xe1e   :  { %v2019_v4 = vmul.f32 %v2018_v13, %v2013_v17  ;;  %v2659_v13 = vld [vmem:[%s4080_s6 + $0xf0] sm:$0xff] }
 0xe1f   :  { %v2026_v9 = vadd.f32 %v2024_v18, %v2020_v19 }
 0xe20   :  { %v2025_v63 = vadd.f32 %v2024_v18, %v2019_v4 }
 0xe22   :  { %3175 = vmatprep.mubr.msk.f32.mxu1 %vm36_vm0, %v2025_v63 }
 0xe23   :  { %3176 = vmatmul.mubr.msk.f32.vlgmr.msra.gmra.mrb[18].mxu1 %vm36_vm0, %v2026_v9 }
 0xe24   :  { %3229 = vmatpush1.bf16.msra.mxu1 %v3228_v32  ;;  %2400 = vmatprep.mubr.f32.mxu1 %v3398_v53 }
 0xe25   :  { %3231 = vmatprep.subr.bf16.mxu1 %v3230_v6 }
 0xe28   :  { %3233 = vmatpush1.bf16.msra.mxu1 %v3232_v11 }
 0xe2b   :  { %2910 = vmatmul.mubr.msk.f32.vlgmr.msra.gmra.mrb[20].mxu1 %vm36_vm0, %v2025_v63  ;;  %v2904_v63 = vsel %vm2222_vm10, 1.0, %v3398_v53 }
 0xe2c   :  { %2406 = vmatprep.mubr.f32.mxu1 %v3398_v53  ;;  %3182 = vmatprep.mubr.msk.f32.mxu0 %vm2228_vm11, %v2904_v63  ;;  %v2633_v63 = vld [vmem:[%s4080_s6 + $0x20] sm:$0xff] }
 0xe2f   :  { %2911 = vmatmul.mubr.msk.f32.gmra.mrb[22].mxu1 %vm36_vm0, %v2026_v9 }
 0xef6   :  { %v3177_v27 = vpop.f32.mrb[18].mxu1 }
 0xef7   :  { %v2103_v28 = vpop.f32.mrb[19].mxu1  ;;  %v2116_v30 = vsel %vm2112_vm3, %v3177_v27, -inf }
 0xef8   :  { %2117 = vmax.xlane.f32.xlu1 %v2116_v30  ;;  %v2113_v34 = vsel %vm2112_vm3, %v2103_v28, -inf }
 0xef9   :  { %2114 = vmax.xlane.f32.xlu0 %v2113_v34 }
 0xefe   :  { %v3772_v35 = vpop.f32.mrb[20].mxu1 }
 0xeff   :  { %v3774_v36 = vpop.f32.mrb[21].mxu1 }
 0xf02   :  { %v3776_v37 = vpop.f32.mrb[22].mxu1 }
 0xf03   :  { %v3778_v38 = vpop.f32.mrb[23].mxu1 }
 0xf85   :  { %v2118_v39 = vpop.xlane.xlu1 %2117 }
 0xf86   :  { %v2120_v43 = vsub.f32 %v3177_v27, %v2118_v39  ;;  %v2115_v44 = vpop.xlane.xlu0 %2114  ;;  %v3262_v27 = vpack.c.bf16 %v2660_v14, %v2659_v13 }
 0xf87   :  { %v2119_v45 = vsub.f32 %v2103_v28, %v2115_v44  ;;  %v2644_v28 = vld [vmem:[%s4080_s6 + $0x78] sm:$0xff] }
 0xf88   :  { %v2123_v46 = vmul.f32 1.442695, %v2120_v43 }
 0xf89   :  { %v2121_v5 = vmul.f32 1.442695, %v2119_v45  ;;  %v3403_v45 = vmov 1.0|1.0  }
 0xf8a   :  { %3322 = vpow2.f32 %v2123_v46 }
 0xf8b   :  { %3324 = vpow2.f32 %v2121_v5  ;;  %v2905_v5 = vsel %vm2223_vm1, 1.0, %v3398_v53 }
 0xf94   :  { %v3323_v47 = vpop.eup %3322 }
 0xf95   :  { %v3325_v48 = vpop.eup %3324  ;;  %v2128_v1 = vsel %vm2112_vm3, %v3323_v47, 0.0 }
 0xf96   :  { %2129 = vadd.xlane.f32.xlu1 %v2128_v1  ;;  %v2125_v49 = vsel %vm2112_vm3, %v3325_v48, 0.0 }
 0xf97   :  { %2126 = vadd.xlane.f32.xlu0 %v2125_v49 }
0x1023   :  { %v2130_v50 = vpop.xlane.xlu1 %2129 }
0x1024   :  { %3326 = vrcp.f32 %v2130_v50  ;;  %v2127_v0 = vpop.xlane.xlu0 %2126 }
0x1025   :  { %3328 = vrcp.f32 %v2127_v0 }
0x102e   :  { %v3327_v51 = vpop.eup %3326 }
0x102f   :  { %v3329_v42 = vpop.eup %3328  ;;  %v2134_v52 = vmul.f32 %v3327_v51, %v3323_v47 }
0x1030   :  { %v2132_v54 = vmul.f32 %v3329_v42, %v3325_v48 }
0x1031   :  { %v2141_v55 = vsel %vm2112_vm3, %v2134_v52, -inf }
0x1032   :  { %2142 = vmax.xlane.f32.xlu1 %v2141_v55  ;;  %v2138_v56 = vsel %vm2112_vm3, %v2132_v54, -inf  ;;  %v2521_v55 = vadd.s32 128, %v3785_v57 }
0x1033   :  { %2139 = vmax.xlane.f32.xlu0 %v2138_v56  ;;  %v2522_v56 = vmul.u32 64, %v3495_v29 }
0x10bf   :  { %v3788_v60 = vpop.xlane.xlu1 %2142 }
0x10c0   :  { %v3790_v61 = vpop.xlane.xlu0 %2139  ;;  %vm2145_vm4 = vcmp.eq.f32.partialorder %v2134_v52, %v3788_v60 }
0x10c1   :  { %v2148_v62 = vsel %vm2145_vm4, %v2146_v59, 0.0  ;;  %vm2144_vm5 = vcmp.eq.f32.partialorder %v2132_v54, %v3790_v61  ;;  %vm2524_vm4 = vcmp.ge.s32.totalorder %v2521_v55, %v2522_v56 }
0x10c2   :  { %v2152_v2 = vsel %vm2112_vm3, %v2148_v62, -inf  ;;  %v2147_v3 = vsel %vm2144_vm5, %v2146_v59, 0.0 }
0x10c3   :  { %2153 = vmax.xlane.f32.xlu1 %v2152_v2  ;;  %v2149_v7 = vsel %vm2112_vm3, %v2147_v3, -inf  ;;  %v3876_v2 = vld [vmem:[%s4081_s7] sm:$0xf]  ;;  %v2646_v3 = vld [vmem:[%s4080_s6 + $0x88] sm:$0xff] }
0x10c4   :  { %2150 = vmax.xlane.f32.xlu0 %v2149_v7  ;;  %v2629_v7 = vld [vmem:[%s4080_s6] sm:$0xff] }
0x1150   :  { %v2154_v25 = vpop.xlane.xlu1 %2153 }
0x1151   :  { %v2156_v8 = vsub.f32 4.0, %v2154_v25  ;;  %v2151_v10 = vpop.xlane.xlu0 %2150 }
0x1152   :  { %v2155_v12 = vsub.f32 4.0, %v2151_v10  ;;  %v2647_v10 = vld [vmem:[%s4080_s6 + $0x90] sm:$0xff] }
0x1153   :  { %vm3796_vm6 = vcmp.eq.f32.partialorder %v2137_v58, %v2156_v8  ;;  %v2630_v8 = vld [vmem:[%s4080_s6 + $0x8] sm:$0xff] }
0x1154   :  { %vm3800_vm7 = vcmp.eq.f32.partialorder %v2137_v58, %v2155_v12  ;;  %v2160_v15 = vsel %vm3796_vm6, -1.0, %v2134_v52  ;;  %v2648_v12 = vld [vmem:[%s4080_s6 + $0x98] sm:$0xff] }
0x1155   :  { %v2164_v16 = vsel %vm2112_vm3, %v2160_v15, -inf  ;;  %v2159_v17 = vsel %vm3800_vm7, -1.0, %v2132_v54  ;;  %v2525_v54 = vadd.s32 1, %v3495_v29 }
0x1156   :  { %2165 = vmax.xlane.f32.xlu1 %v2164_v16  ;;  %v2161_v18 = vsel %vm2112_vm3, %v2159_v17, -inf  ;;  %v3238_v16 = vpack.c.bf16 %v2648_v12, %v2647_v10 }
0x1157   :  { %2162 = vmax.xlane.f32.xlu0 %v2161_v18  ;;  %v2632_v18 = vld [vmem:[%s4080_s6 + $0x18] sm:$0xff] }
0x11e3   :  { %v3810_v19 = vpop.xlane.xlu1 %2165 }
0x11e4   :  { %v3812_v20 = vpop.xlane.xlu0 %2162  ;;  %vm2168_vm8 = vcmp.eq.f32.partialorder %v2160_v15, %v3810_v19  ;;  %v3236_v15 = vpack.c.bf16 %v2630_v8, %v2629_v7 }
0x11e5   :  { %v2170_v21 = vsel %vm2168_vm8, %v2146_v59, 0.0  ;;  %vm2167_vm9 = vcmp.eq.f32.partialorder %v2159_v17, %v3812_v20  ;;  %v2631_v17 = vld [vmem:[%s4080_s6 + $0x10] sm:$0xff]  ;;  %v2181_v7 = vadd.f32 %v3812_v20, %v3790_v61 }
0x11e6   :  { %v2174_v4 = vsel %vm2112_vm3, %v2170_v21, -inf  ;;  %v2169_v22 = vsel %vm2167_vm9, %v2146_v59, 0.0  ;;  %vm2523_vm9 = vcmp.ge.s32.totalorder %v3785_v57, %v2522_v56  ;;  %v2649_v21 = vld [vmem:[%s4080_s6 + $0xa0] sm:$0xff] }
0x11e7   :  { %2175 = vmax.xlane.f32.xlu1 %v2174_v4  ;;  %v2171_v23 = vsel %vm2112_vm3, %v2169_v22, -inf  ;;  %v2650_v4 = vld [vmem:[%s4080_s6 + $0xa8] sm:$0xff]  ;;  %v3240_v22 = vpack.c.bf16 %v2632_v18, %v2631_v17  ;;  %v2641_v56 = vld [vmem:[%s4080_s6 + $0x60] sm:$0xff] }
0x11e8   :  { %2172 = vmax.xlane.f32.xlu0 %v2171_v23  ;;  %v3242_v23 = vpack.c.bf16 %v2650_v4, %v2649_v21 }
0x1274   :  { %v2176_v32 = vpop.xlane.xlu1 %2175 }
0x1275   :  { %v2178_v9 = vsub.f32 4.0, %v2176_v32  ;;  %v2173_v6 = vpop.xlane.xlu0 %2172  ;;  %v2634_v32 = vld [vmem:[%s4080_s6 + $0x28] sm:$0xff] }
0x1276   :  { %v2177_v26 = vsub.f32 4.0, %v2173_v6  ;;  %v2652_v6 = vld [vmem:[%s4080_s6 + $0xb8] sm:$0xff]  ;;  %v3244_v24 = vpack.c.bf16 %v2634_v32, %v2633_v63 }
0x1277   :  { %vm3823_vm12 = vcmp.eq.f32.partialorder %v2137_v58, %v2178_v9  ;;  %v2651_v9 = vld [vmem:[%s4080_s6 + $0xb0] sm:$0xff] }
0x1278   :  { %vm3831_vm13 = vmor %vm3796_vm6, %vm3823_vm12  ;;  %vm3835_vm14 = vcmp.eq.f32.partialorder %v2137_v58, %v2177_v26  ;;  %v2526_v58 = vmul.u32 64, %v2525_v54  ;;  %v3246_v26 = vpack.c.bf16 %v2652_v6, %v2651_v9 }
0x1279   :  { %v2902_v30 = vsel %vm3831_vm13, 1.0, %v3398_v53  ;;  %vm3846_vm15 = vmor %vm3800_vm7, %vm3835_vm14 }
0x127a   :  { %v2202_v39 = vsel %vm2112_vm3, %v2902_v30, 0.0  ;;  %v2901_v43 = vsel %vm3846_vm15, 1.0, %v3398_v53  ;;  %vm3222_vm2 = vmpackc.low %vm3831_vm13, %vm3846_vm15  ;;  %vm2528_vm5 = vcmp.lt.s32.totalorder %v2521_v55, %v2526_v58  ;;  %vm2527_vm10 = vcmp.lt.s32.totalorder %v3785_v57, %v2526_v58  ;;  %v2645_v57 = vld [vmem:[%s4080_s6 + $0x80] sm:$0xff]  ;;  %v2635_v30 = vld [vmem:[%s4080_s6 + $0x30] sm:$0xff] }
0x127b   :  { %v2201_v44 = vsel %vm2112_vm3, %v2901_v43, 0.0  ;;  %3223 = vmatprep.subr.msk.bf16.mxu0 %vm3222_vm2, %v3403_v45  ;;  %vm2530_vm8 = vmand %vm2524_vm4, %vm2528_vm5  ;;  %v3234_v25 = vpack.c.bf16 %v2646_v3, %v2645_v57  ;;  %v2653_v43 = vld [vmem:[%s4080_s6 + $0xc0] sm:$0xff]  ;;  %v2642_v58 = vld [vmem:[%s4080_s6 + $0x68] sm:$0xff]  ;;  %v2182_v3 = vadd.f32 %v3810_v19, %v3788_v60 }
0x127c   :  { %v2203_v46 = vadd.f32 %v2202_v39, %v2201_v44  ;;  %3225 = vmatpush3.bf16.msk.msra.mxu0 %vm3222_vm2, %v3403_v45  ;;  %v2913_v59 = vsel %vm2530_vm8, 1.0, %v3398_v53  ;;  %vm2529_vm1 = vmand %vm2523_vm9, %vm2527_vm10  ;;  %v2636_v39 = vld [vmem:[%s4080_s6 + $0x38] sm:$0xff]  ;;  %v2654_v44 = vld [vmem:[%s4080_s6 + $0xc8] sm:$0xff]  ;;  %vm2217_vm2 = vcmask 0  }
0x127d   :  { %v2912_v62 = vsel %vm2529_vm1, 1.0, %v3398_v53  ;;  %3235 = vmatprep.subr.bf16.mxu1 %v3234_v25  ;;  %v3248_v45 = vpack.c.bf16 %v2636_v39, %v2635_v30  ;;  %3330 = vrcp.f32 %v2182_v3 }
0x127e   :  { %v2204_v47 = vrot.slane %v2203_v46, 4  ;;  %3237 = vmatpush3.bf16.msra.mxu1 %v3236_v15  ;;  %3332 = vrcp.f32 %v2181_v7 }
0x127f   :  { %3183 = vmatmul.mubr.msk.f32.vlgmr.msra.gmra.mrb[22].mxu0 %vm2228_vm11, %v2905_v5  ;;  %vm2541_vm11 = vcmask 1043456   ;;  %3239 = vmatprep.subr.bf16.mxu1 %v3238_v16  ;;  %v2637_v5 = vld [vmem:[%s4080_s6 + $0x40] sm:$0xff] }
0x1280   :  { %v2205_v48 = vadd.f32 %v2204_v47, %v2203_v46  ;;  %2612 = vmatprep.mubr.f32.mxu0 %v3398_v53  ;;  %2914 = vmatprep.subr.msk.mxu0 %vm2541_vm11, %v2913_v59  ;;  %v3250_v46 = vpack.c.bf16 %v2654_v44, %v2653_v43  ;;  %v2638_v47 = vld [vmem:[%s4080_s6 + $0x48] sm:$0xff]  ;;  %v3260_v59 = vpack.c.bf16 %v2642_v58, %v2641_v56 }
0x1281   :  { %2915 = vmatpush1.msk.msra.mxu0 %vm2541_vm11, %v2912_v62 }
0x1282   :  { %v2206_v1 = vrot.slane %v2205_v48, 2  ;;  %3185 = vmatprep.subr.msk.mxu0 %vm2541_vm11, %v3876_v2  ;;  %3241 = vmatpush3.bf16.msra.mxu1 %v3240_v22 }
0x1283   :  { %3243 = vmatprep.subr.bf16.mxu1 %v3242_v23 }
0x1284   :  { %v2207_v49 = vadd.f32 %v2206_v1, %v2205_v48  ;;  %v2655_v48 = vld [vmem:[%s4080_s6 + $0xd0] sm:$0xff]  ;;  %v2656_v1 = vld [vmem:[%s4080_s6 + $0xd8] sm:$0xff] }
0x1286   :  { %v2208_v50 = vrot.slane %v2207_v49, 1  ;;  %3245 = vmatpush3.bf16.msra.mxu1 %v3244_v24 }
0x1287   :  { %3247 = vmatprep.subr.bf16.mxu1 %v3246_v26  ;;  %v3331_v25 = vpop.eup %3330 }
0x1288   :  { %v2209_v0 = vadd.f32 %v2208_v50, %v2207_v49  ;;  %v3252_v49 = vpack.c.bf16 %v2638_v47, %v2637_v5  ;;  %v3254_v50 = vpack.c.bf16 %v2656_v1, %v2655_v48  ;;  %v3333_v8 = vpop.eup %3332  ;;  %v2190_v10 = vmul.f32 %v3331_v25, %v3810_v19 }
0x1289   :  { %v2186_v12 = vmul.f32 %v3331_v25, %v3788_v60  ;;  %v2189_v15 = vmul.f32 %v3333_v8, %v3812_v20  ;;  %v2184_v16 = vmul.f32 %v3333_v8, %v3790_v61 }
0x128a   :  { %v2903_v51 = vadd.f32 -8.0, %v2209_v0  ;;  %3249 = vmatpush3.bf16.msra.mxu1 %v3248_v45  ;;  %v2639_v0 = vld [vmem:[%s4080_s6 + $0x50] sm:$0xff]  ;;  %v2192_v17 = vsel %vm3823_vm12, %v2190_v10, 0.0 }
0x128b   :  { %3251 = vmatprep.subr.bf16.mxu1 %v3250_v46  ;;  %v2191_v18 = vsel %vm3835_vm14, %v2189_v15, 0.0  ;;  %v2188_v21 = vsel %vm3796_vm6, %v2186_v12, 0.0  ;;  %v2187_v19 = vsel %vm3800_vm7, %v2184_v16, 0.0 }
0x128c   :  { %v2211_v42 = vmul.f32 %v2903_v51, %v2903_v51  ;;  %v2640_v51 = vld [vmem:[%s4080_s6 + $0x58] sm:$0xff]  ;;  %v2194_v22 = vadd.f32 %v2192_v17, %v2188_v21  ;;  %v2193_v61 = vadd.f32 %v2191_v18, %v2187_v19 }
0x128d   :  { %v3256_v54 = vpack.c.bf16 %v2640_v51, %v2639_v0 }
0x128e   :  { %v2212_v52 = vsel %vm2112_vm3, %v2211_v42, 0.0  ;;  %v2657_v42 = vld [vmem:[%s4080_s6 + $0xe0] sm:$0xff]  ;;  %3253 = vmatpush3.bf16.msra.mxu1 %v3252_v49 }
0x128f   :  { %2213 = vadd.xlane.f32.xlu0 %v2212_v52  ;;  %v2658_v52 = vld [vmem:[%s4080_s6 + $0xe8] sm:$0xff]  ;;  %3255 = vmatprep.subr.bf16.mxu1 %v3254_v50 }
0x1290   :  { %v3258_v55 = vpack.c.bf16 %v2658_v52, %v2657_v42 }
0x1292   :  { %3257 = vmatpush3.bf16.msra.mxu1 %v3256_v54 }
0x1293   :  { %3259 = vmatprep.subr.bf16.mxu1 %v3258_v55 }
0x1296   :  { %3261 = vmatpush3.bf16.msra.mxu1 %v3260_v59 }
0x1297   :  { %3263 = vmatprep.subr.bf16.mxu1 %v3262_v27 }
0x131c   :  { %v2214_v62 = vpop.xlane.xlu0 %2213 }
0x131d   :  { %v2216_v57 = vmul.f32 0.00390625, %v2214_v62 }
0x131f   :  { %2218 = vst.msk [vmem:[#allocation4] sm:$0x1] %vm2217_vm2, %v2216_v57 }
0x1352   :  { %v3184_v4 = vpop.f32.mrb[22].mxu0 }
0x1353   :  { %vm2311_vm4 = vcmp.le.f32.partialorder %v3184_v4, 4.0  ;;  %v2301_v60 = vpop.f32.mrb[23].mxu0 }
0x1354   :  { %vm2313_vm5 = vmand %vm3831_vm13, %vm2311_vm4  ;;  %vm2310_vm8 = vcmp.le.f32.partialorder %v2301_v60, 4.0 }
0x1355   :  { %v2315_v20 = vsel %vm2313_vm5, %v2194_v22, 0.0  ;;  %vm2312_vm12 = vmand %vm3846_vm15, %vm2310_vm8 }
0x1356   :  { %v2314_v11 = vsel %vm2312_vm12, %v2193_v61, 0.0 }
0x1357   :  { %2916 = vmatmul.mubr.msk.f32.vlgmr.msra.gmra.mrb[24].mxu0 %vm2112_vm3, %v2314_v11 }
0x1358   :  { %2618 = vmatprep.mubr.f32.mxu0 %v3398_v53  ;;  %3186 = vmatpush3.msk.msra.mxu0 %vm2541_vm11, %v3876_v2  ;;  %v2643_v53 = vld [vmem:[%s4080_s6 + $0x70] sm:$0xff]  ;;  %v2324_v2 = vld [vmem:[%s4079_s5] sm:$0x3]  ;;  %s3404_s5 = smov [#allocation4]  }
0x1359   :  { %v3264_v34 = vpack.c.bf16 %v2644_v28, %v2643_v53  ;;  %v2329_v23 = vrot.slane %v2324_v2, %v66_v31  ;;  %v2333_v63 = vrot.slane %v2324_v2, %v72_v33  ;;  %s2837_s6 = sshll.u32 %s3404_s5, 4  ;;  %s2838_s6 = int_to_ptr.vmem [resolvable:$true] %s2837_s6 }
0x135a   :  { %s3350_s13 = scalar_lea.vmem %s2838_s6, 16  ;;  %s3354_s3 = scalar_lea.vmem %s2838_s6, 32 }
0x135b   :  { %2917 = vmatmul.mubr.msk.f32.gmra.mrb[26].mxu0 %vm2112_vm3, %v2315_v20  ;;  %3265 = vmatpush3.bf16.msra.mxu1 %v3264_v34  ;;  %v4011_v32 = vadd.f32 %v3772_v35, %v2329_v23  ;;  %v4014_v9 = vadd.f32 %v3774_v36, %v2333_v63  ;;  %v4020_v24 = vadd.f32 %v3776_v37, %v2329_v23  ;;  %p3351_p0 = scmp.ne.s32.totalorder %s2838_s6, %s3350_s13  ;;  %p3355_p1 = scmp.lt.s32.totalorder %s2838_s6, %s2838_s6 }
0x135c   :  { %3187 = vmatprep.mubr.msk.f32.mxu0 %vm2112_vm3, %v2314_v11  ;;  %v4026_v31 = vadd.f32 %v3778_v38, %v2333_v63  ;;  %p3356_p2 = scmp.lt.s32.totalorder %s3354_s3, %s3350_s13 }
0x135d   :  { %v4017_v6 = vmul.f32 0.70710677, %v4011_v32  ;;  %v4023_v26 = vmul.f32 0.70710677, %v4014_v9  ;;  %v4030_v33 = vmul.f32 0.70710677, %v4020_v24 }
0x135e   :  { %v4034_v36 = vmul.f32 0.70710677, %v4026_v31  ;;  %p3357_p3 = por %p3356_p2, %p3355_p1 }
0x135f   :  { %3188 = vmatmul.mubr.msk.f32.vlgmr.msra.gmra.mrb[28].mxu0 %vm2112_vm3, %v2315_v20  ;;  %v2421_v29 = vand.u32 2147483647, %v4017_v6  ;;  %v2422_v35 = vand.u32 2147483647, %v4023_v26  ;;  %v2423_v37 = vand.u32 2147483647, %v4030_v33 }
0x1360   :  { %v2424_v43 = vand.u32 2147483647, %v4034_v36  ;;  %vm2501_vm3 = vcmp.ge.f32.partialorder %v4017_v6, 0.0  ;;  %vm2502_vm6 = vcmp.ge.f32.partialorder %v4023_v26, 0.0  ;;  %vm2503_vm7 = vcmp.ge.f32.partialorder %v4030_v33, 0.0  ;;  %p3358_p4 = pnand %p3357_p3, %p3351_p0 }
0x1361   :  { %v2425_v30 = vmul.f32 0.3275911, %v2421_v29  ;;  %v2426_v39 = vmul.f32 0.3275911, %v2422_v35  ;;  %v2427_v45 = vmul.f32 0.3275911, %v2423_v37  ;;  %v2477_v7 = vmul.f32 %v2421_v29, %v2421_v29 }
0x1362   :  { %v2428_v46 = vmul.f32 0.3275911, %v2424_v43  ;;  %v2478_v10 = vmul.f32 %v2422_v35, %v2422_v35  ;;  %v2479_v17 = vmul.f32 %v2423_v37, %v2423_v37  ;;  %v2480_v22 = vmul.f32 %v2424_v43, %v2424_v43 }
0x1363   :  { %v2429_v44 = vadd.f32 1.0, %v2425_v30  ;;  %v2430_v38 = vadd.f32 1.0, %v2426_v39  ;;  %v2431_v5 = vadd.f32 1.0, %v2427_v45  ;;  %v2481_v16 = vsub.f32 0.0, %v2477_v7 }
0x1364   :  { %v2432_v47 = vadd.f32 1.0, %v2428_v46  ;;  %v2482_v4 = vsub.f32 0.0, %v2478_v10  ;;  %v2483_v20 = vsub.f32 0.0, %v2479_v17  ;;  %v2484_v27 = vsub.f32 0.0, %v2480_v22 }
0x1365   :  { %3334 = vrcp.f32 %v2429_v44  ;;  %v2485_v61 = vmul.f32 1.442695, %v2481_v16  ;;  %vm2504_vm13 = vcmp.ge.f32.partialorder %v4034_v36, 0.0  ;;  %v2413_v10 = vmul.f32 0.5, %v4011_v32 }
0x1366   :  { %3336 = vrcp.f32 %v2430_v38  ;;  %v2487_v14 = vmul.f32 1.442695, %v2482_v4  ;;  %v2489_v34 = vmul.f32 1.442695, %v2483_v20  ;;  %v2491_v63 = vmul.f32 1.442695, %v2484_v27 }
0x1367   :  { %3338 = vrcp.f32 %v2431_v5  ;;  %v2416_v33 = vmul.f32 0.5, %v4026_v31 }
0x1368   :  { %3340 = vrcp.f32 %v2432_v47 }
0x1369   :  { %3342 = vpow2.f32 %v2485_v61 }
0x136a   :  { %3344 = vpow2.f32 %v2487_v14 }
0x136b   :  { %3346 = vpow2.f32 %v2489_v34 }
0x136c   :  { %3348 = vpow2.f32 %v2491_v63 }
0x136f   :  { %v3335_v48 = vpop.eup %3334 }
0x1370   :  { %v3337_v1 = vpop.eup %3336  ;;  %v2441_v49 = vmul.f32 1.0614054, %v3335_v48 }
0x1371   :  { %v3339_v50 = vpop.eup %3338  ;;  %v2442_v0 = vmul.f32 1.0614054, %v3337_v1 }
0x1372   :  { %v3341_v51 = vpop.eup %3340  ;;  %v2445_v42 = vadd.f32 -1.4531521, %v2441_v49  ;;  %v2443_v52 = vmul.f32 1.0614054, %v3339_v50 }
0x1373   :  { %v2446_v54 = vadd.f32 -1.4531521, %v2442_v0  ;;  %v2444_v55 = vmul.f32 1.0614054, %v3341_v51  ;;  %v3343_v38 = vpop.eup %3342 }
0x1374   :  { %v2449_v56 = vmul.f32 %v3335_v48, %v2445_v42  ;;  %v2447_v58 = vadd.f32 -1.4531521, %v2443_v52  ;;  %v3345_v46 = vpop.eup %3344 }
0x1375   :  { %v2450_v59 = vmul.f32 %v3337_v1, %v2446_v54  ;;  %v2448_v62 = vadd.f32 -1.4531521, %v2444_v55  ;;  %v3347_v42 = vpop.eup %3346 }
0x1376   :  { %v2453_v57 = vadd.f32 1.4214138, %v2449_v56  ;;  %v2451_v3 = vmul.f32 %v3339_v50, %v2447_v58  ;;  %v3349_v52 = vpop.eup %3348 }
0x1377   :  { %v2454_v25 = vadd.f32 1.4214138, %v2450_v59  ;;  %v2452_v8 = vmul.f32 %v3341_v51, %v2448_v62 }
0x1378   :  { %v2457_v12 = vmul.f32 %v3335_v48, %v2453_v57  ;;  %v2455_v15 = vadd.f32 1.4214138, %v2451_v3 }
0x1379   :  { %v2458_v18 = vmul.f32 %v3337_v1, %v2454_v25  ;;  %v2456_v21 = vadd.f32 1.4214138, %v2452_v8 }
0x137a   :  { %v2461_v19 = vadd.f32 -0.28449672, %v2457_v12  ;;  %v2459_v60 = vmul.f32 %v3339_v50, %v2455_v15  ;;  %v2414_v15 = vmul.f32 0.5, %v4014_v9 }
0x137b   :  { %v2462_v11 = vadd.f32 -0.28449672, %v2458_v18  ;;  %v2460_v13 = vmul.f32 %v3341_v51, %v2456_v21  ;;  %v2415_v21 = vmul.f32 0.5, %v4020_v24 }
0x137c   :  { %v2465_v53 = vmul.f32 %v3335_v48, %v2461_v19  ;;  %v2463_v28 = vadd.f32 -0.28449672, %v2459_v60 }
0x137d   :  { %v2466_v2 = vmul.f32 %v3337_v1, %v2462_v11  ;;  %v2464_v23 = vadd.f32 -0.28449672, %v2460_v13 }
0x137e   :  { %v2469_v29 = vadd.f32 0.2548296, %v2465_v53  ;;  %v2467_v35 = vmul.f32 %v3339_v50, %v2463_v28 }
0x137f   :  { %v2470_v30 = vadd.f32 0.2548296, %v2466_v2  ;;  %v2468_v37 = vmul.f32 %v3341_v51, %v2464_v23 }
0x1380   :  { %v2473_v39 = vmul.f32 %v3335_v48, %v2469_v29  ;;  %v2471_v43 = vadd.f32 0.2548296, %v2467_v35 }
0x1381   :  { %v2474_v44 = vmul.f32 %v3337_v1, %v2470_v30  ;;  %v2472_v45 = vadd.f32 0.2548296, %v2468_v37 }
0x1382   :  { %v2493_v5 = vmul.f32 %v3343_v38, %v2473_v39  ;;  %v2475_v47 = vmul.f32 %v3339_v50, %v2471_v43 }
0x1383   :  { %v2494_v49 = vmul.f32 %v3345_v46, %v2474_v44  ;;  %v2476_v0 = vmul.f32 %v3341_v51, %v2472_v45 }
0x1384   :  { %v2497_v54 = vsub.f32 1.0, %v2493_v5  ;;  %v2495_v55 = vmul.f32 %v3347_v42, %v2475_v47 }
0x1385   :  { %v2498_v56 = vsub.f32 1.0, %v2494_v49  ;;  %v2496_v58 = vmul.f32 %v3349_v52, %v2476_v0 }
0x1386   :  { %v2505_v59 = vsub.f32 0.0, %v2497_v54  ;;  %v2499_v62 = vsub.f32 1.0, %v2495_v55 }
0x1387   :  { %v2506_v57 = vsub.f32 0.0, %v2498_v56  ;;  %v2500_v3 = vsub.f32 1.0, %v2496_v58 }
0x1388   :  { %v2509_v48 = vsel %vm2501_vm3, %v2497_v54, %v2505_v59  ;;  %v2507_v1 = vsub.f32 0.0, %v2499_v62 }
0x1389   :  { %v2510_v7 = vsel %vm2502_vm6, %v2498_v56, %v2506_v57  ;;  %v2508_v50 = vsub.f32 0.0, %v2500_v3  ;;  %v2513_v51 = vadd.f32 1.0, %v2509_v48 }
0x138a   :  { %v2514_v25 = vadd.f32 1.0, %v2510_v7  ;;  %v2511_v8 = vsel %vm2503_vm7, %v2499_v62, %v2507_v1 }
0x138b   :  { %v2512_v12 = vsel %vm2504_vm13, %v2500_v3, %v2508_v50  ;;  %v2517_v16 = vmul.f32 %v2513_v51, %v2413_v10  ;;  %v2515_v6 = vadd.f32 1.0, %v2511_v8 }
0x138c   :  { %v2518_v26 = vmul.f32 %v2514_v25, %v2414_v15  ;;  %v2516_v18 = vadd.f32 1.0, %v2512_v12 }
0x138d   :  { %v2519_v36 = vmul.f32 %v2515_v6, %v2415_v21 }
0x138e   :  { %v2520_v61 = vmul.f32 %v2516_v18, %v2416_v33 }
0x142a   :  { %v2614_v17 = vpop.f32.mrb[24].mxu0 }
0x142b   :  { %v2625_v4 = vmul.f32 %v2614_v17, %v2517_v16  ;;  %v2616_v22 = vpop.f32.mrb[25].mxu0 }
0x142c   :  { %v2626_v19 = vmul.f32 %v2616_v22, %v2518_v26 }
0x142e   :  { %v2620_v60 = vpop.f32.mrb[26].mxu0  ;;  %2804 = vmatprep.mubr.f32.mxu1 %v2626_v19 }
0x142f   :  { %v2627_v32 = vmul.f32 %v2620_v60, %v2519_v36  ;;  %v2622_v20 = vpop.f32.mrb[27].mxu0  ;;  %2805 = vmatmul.mubr.f32.vlgmr.msra.gmra.mrb[24].mxu1 %v2625_v4 }
0x1430   :  { %v2628_v9 = vmul.f32 %v2622_v20, %v2520_v61 }
0x1432   :  { %v3189_v11 = vpop.f32.mrb[28].mxu0  ;;  %2809 = vmatprep.mubr.f32.mxu1 %v2628_v9 }
0x1433   :  { %v2731_v13 = vpop.f32.mrb[29].mxu0  ;;  %2810 = vmatmul.mubr.f32.gmra.mrb[26].mxu1 %v2627_v32 }
0x1434   :  { %3361 = shalt.err (!%p3358_p4)
}
0x1435   :  { %s3362_s16 = scalar_lea.hbm %s4083_s9, 16 }
0x1436   :  { %p3363_p5 = scmp.ne.s32.totalorder %s4083_s9, %s3362_s16  ;;  %p3366_p6 = scmp.lt.u32.totalorder %s3362_s16, %s4083_s9 }
0x1438   :  { %p3368_p7 = pnand %p3366_p6, %p3363_p5 }
0x143a   :  { %3371 = shalt.err (!%p3368_p7)
}
0x143b   :  { %2840 = dma.vmem_to_hbm [thread:$0]  %s2838_s6, 16, %s4083_s9, [#allocation5]  }
0x143c   :  { %s3405_s23 = smov [#allocation2]  }
0x143d   :  { %s2824_s24 = sshll.u32 %s3405_s23, 4  ;;  %s2825_s24 = int_to_ptr.vmem [resolvable:$true] %s2824_s24 }
0x143e   :  { %s3372_s9 = scalar_lea.vmem %s2825_s24, 256  ;;  %p3377_p9 = scmp.lt.s32.totalorder %s2825_s24, %s2825_s24 }
0x143f   :  { %p3373_p8 = scmp.ne.s32.totalorder %s2825_s24, %s3372_s9  ;;  %p3378_p10 = scmp.lt.s32.totalorder %s3372_s9, %s3372_s9 }
0x1441   :  { %p3379_p11 = por %p3378_p10, %p3377_p9 }
0x1443   :  { %p3380_p12 = pnand %p3379_p11, %p3373_p8 }
0x1502   :  { %v3028_v24 = vpop.f32.mrb[24].mxu1 }
0x1503   :  { %v3029_v31 = vpop.f32.mrb[25].mxu1 }
0x1504   :  { %v3030_v14 = vadd.f32 %v3029_v31, %v3028_v24 }
0x1506   :  { %v2807_v27 = vadd.f32 %v3030_v14, %v2731_v13  ;;  %v3031_v53 = vpop.f32.mrb[26].mxu1 }
0x1507   :  { %v3032_v28 = vpop.f32.mrb[27].mxu1 }
0x1508   :  { %v2815_v34 = vadd.f32 %v2807_v27, %v3714_v41  ;;  %v3033_v2 = vadd.f32 %v3032_v28, %v3031_v53 }
0x150a   :  { %2817 = vst.msk [vmem:[#allocation2] sm:$0xff] %vm36_vm0, %v2815_v34  ;;  %v2812_v23 = vadd.f32 %v3189_v11, %v3033_v2 }
0x150c   :  { %v2816_v63 = vadd.f32 %v2812_v23, %v3711_v40 }
0x150e   :  { %2818 = vst.msk [vmem:[#allocation2 + $0x8] sm:$0xff] %vm36_vm0, %v2816_v63 }
0x150f   :  { %3383 = shalt.err (!%p3380_p12)
}
0x1510   :  { %s3384_s2 = scalar_lea.hbm %s4082_s8, 256 }
0x1511   :  { %p3385_p13 = scmp.ne.s32.totalorder %s4082_s8, %s3384_s2  ;;  %p3388_p0 = scmp.lt.u32.totalorder %s3384_s2, %s4082_s8 }
0x1513   :  { %p3390_p1 = pnand %p3388_p0, %p3385_p13 }
0x1515   :  { %3393 = shalt.err (!%p3390_p1)
}
0x1516   :  { %s3406_s29 = smov 128   ;;  %s3407_s30 = smov 8  }
0x1517   :  { %2830 = dma.vmem_to_hbm [thread:$0]  %s2825_s24, 256, %s4082_s8, [#allocation3], %s3406_s29, %s3406_s29, %s3407_s30  }
0x1518   :  { %3394 = dma.done.wait [#allocation3], 256  }
0x1519   :  { %3395 = vsyncadd [#allocation3], 4294967040 }
0x151a   :  { %3396 = dma.done.wait [#allocation5], 16  }
0x151b   :  { %3397 = vsyncadd [#allocation5], 4294967280 }
0x151c   :  { %2847 = vsyncpa [#allocation3], 1 }
0x151d   :  { %2848 = vsyncpa [#allocation5], 1 }

</bundles_post_ra>
